<compile_context>
chip_gen: v7x
topology: tpu7x:2x2x1
jax: 0.10.0
libtpu: 0.0.40
codegen_flags: <defaults>
</compile_context>

<pallas_src>
import functools

import jax
import jax.numpy as jnp
from jax import lax
from jax.experimental import pallas as pl
from jax.experimental.pallas import tpu as pltpu


GRAM_COMPUTE_DTYPE = jnp.bfloat16   # MXU feed dtype for the Gram pass (configurable).


def _eye(dim, dtype):
    r = lax.broadcasted_iota(jnp.int32, (dim, dim), 0)
    c = lax.broadcasted_iota(jnp.int32, (dim, dim), 1)
    return (r == c).astype(dtype)


def _vmem_capacity_bytes():
    """Physical VMEM of this generation (128 MiB v5e/v6e, 64 MiB v7x); safe fallback."""
    try:
        cap = int(pltpu.get_tpu_info().vmem_capacity_bytes)
        if cap > 0:
            return cap
    except Exception:
        pass
    return 64 << 20          # conservative: assume the smallest (v7x-sized) VMEM


def _num_tensorcores():
    """TensorCores per device (2 on dual-TC chips such as v7x).  Perf hint only."""
    try:
        info = pltpu.get_tpu_info()
        for attr in ("num_tensorcores", "tensorcores_per_chip", "num_cores",
                     "cores_per_chip", "num_cores_per_chip"):
            v = getattr(info, attr, None)
            if isinstance(v, int) and not isinstance(v, bool) and v >= 1:
                return min(int(v), 2)
    except Exception:
        pass
    try:
        dev = jax.devices()[0]
        for attr in ("num_cores", "cores_per_chip", "core_count"):
            v = getattr(dev, attr, None)
            if isinstance(v, int) and not isinstance(v, bool) and v >= 1:
                return min(int(v), 2)
        kind = dev.device_kind.lower()
    except Exception:
        return 1
    return 2 if any(t in kind for t in ("v7", "7x", "v5p", "v4")) else 1


# ------------------------------------------------------------------------------
# Kernel 1: Gram matrix  S = y @ y^T   (the only data-sized pass over y)
# ------------------------------------------------------------------------------
def _gram_kernel(n, tn, kt, compute_dtype, needs_mask, y_ref, s_ref):
    # Output block index is constant along grid axis 1 -> VMEM-resident accumulator.
    @pl.when(pl.program_id(1) == 0)
    def _():
        s_ref[...] = jnp.zeros_like(s_ref)

    yb = y_ref[...]                                       # (p, tn), y's native dtype
    if needs_mask:
        # Ragged n: zero columns past the end in-kernel instead of pre-padding y in HBM.
        blk = pl.program_id(0) * kt + pl.program_id(1)
        col = blk * tn + lax.broadcasted_iota(jnp.int32, (1, yb.shape[1]), 1)
        yb = jnp.where(col < n, yb, 0.0)
    if yb.dtype != compute_dtype:
        yb = yb.astype(compute_dtype)                     # fused in-kernel cast (free slot)
    s_ref[...] += lax.dot_general(                        # y_blk @ y_blk^T, f32 accumulation
        yb, yb, dimension_numbers=(((1,), (1,)), ((), ())),
        preferred_element_type=jnp.float32)


def gram(y, *, compute_dtype=GRAM_COMPUTE_DTYPE, max_tn=32 * 1024, n_splits=None):
    """S = y @ y^T with a single HBM pass over y (no boundary cast, no pad pass)."""
    p, n = y.shape
    if n_splits is None:
        n_splits = _num_tensorcores()
    n_splits = max(1, min(int(n_splits), pl.cdiv(n, 128)))       # don't over-split tiny n

    vmem_cap = _vmem_capacity_bytes()
    in_item = jnp.dtype(y.dtype).itemsize
    cmp_item = jnp.dtype(compute_dtype).itemsize
    # Per-column working set: double-buffered input block + mask/cast intermediates.
    bytes_per_col = p * (3 * in_item + cmp_item)
    budget = min(vmem_cap // 2, 48 << 20)
    tn_cap = max(128, (budget // bytes_per_col) // 128 * 128)

    per_split = pl.cdiv(n, n_splits)
    if n < 128:
        tn = n                                                   # whole array = one block
    else:
        tn = int(min(max_tn, tn_cap,
                     ((per_split + 127) // 128) * 128,
                     (n // 128) * 128))                          # keep block start < n
    kt = pl.cdiv(per_split, tn)
    last_blk = pl.cdiv(n, tn) - 1                                # last block with real cols
    needs_mask = (n_splits * kt * tn) != n

    if needs_mask:
        # Clamp so boundary/overhang blocks stay in range; the kernel masks them out.
        in_idx = lambda c, j: (0, jnp.minimum(c * kt + j, last_blk))
    else:
        in_idx = lambda c, j: (0, c * kt + j)

    vmem_limit = int(min(max(32 << 20, 4 * p * tn * in_item + (8 << 20)),
                         max(vmem_cap - (16 << 20), 16 << 20)))

    partials = pl.pallas_call(
        functools.partial(_gram_kernel, n, tn, kt, compute_dtype, needs_mask),
        out_shape=jax.ShapeDtypeStruct((n_splits, p, p), jnp.float32),
        grid_spec=pltpu.PrefetchScalarGridSpec(
            num_scalar_prefetch=0,
            grid=(n_splits, kt),
            in_specs=[pl.BlockSpec((p, tn), in_idx)],
            out_specs=pl.BlockSpec((None, p, p), lambda c, j: (c, 0, 0))),
        compiler_params=pltpu.CompilerParams(
            dimension_semantics=("parallel", "arbitrary"),       # dual-TC split on v7x
            vmem_limit_bytes=vmem_limit),
    )(y)
    return partials[0] if n_splits == 1 else jnp.sum(partials, axis=0)


# ------------------------------------------------------------------------------
# Kernel 2: the WHOLE EM loop fused into one VMEM-resident kernel.
# ------------------------------------------------------------------------------
def _inv_small_kk(A):
    """Gauss-Jordan inverse of a tiny SPD (k, k) matrix (unrolled, no pivoting)."""
    k = A.shape[0]
    ri = lax.broadcasted_iota(jnp.int32, (k, k), 0)
    ci = lax.broadcasted_iota(jnp.int32, (k, k), 1)
    inv = (ri == ci).astype(jnp.float32)
    a = A
    for i in range(k):                                           # k is tiny & static
        prow = (ri == i)
        pcol = (ci == i)
        pivot = jnp.sum(jnp.where(prow & pcol, a, 0.0), keepdims=True)            # (1,1)
        arow = jnp.sum(jnp.where(prow, a, 0.0), axis=0, keepdims=True) / pivot    # (1,k)
        irow = jnp.sum(jnp.where(prow, inv, 0.0), axis=0, keepdims=True) / pivot
        acol = jnp.sum(jnp.where(pcol, a, 0.0), axis=1, keepdims=True)            # (k,1)
        a = jnp.where(prow, jnp.broadcast_to(arow, a.shape), a - acol * arow)
        inv = jnp.where(prow, jnp.broadcast_to(irow, inv.shape), inv - acol * irow)
    return inv
    # TODO(synk): no pivoting / no ridge (matches the reference's plain inverse);
    # a near-singular Ezz early in EM is as fragile here as it is in the reference.


def _em_kernel(n, n_iters, s_ref, lam0_ref, psi0_ref,
               lam_ref, psi_ref, nll_ref, syz_sc, ezz_sc):
    """Run all n_iters EM iterations with S / Lambda / Psi resident in VMEM."""
    f32 = jnp.float32
    S = s_ref[...]                                               # (p, p)
    p = S.shape[0]
    k = lam0_ref.shape[1]
    eye_k = _eye(k, f32)
    eye_p = _eye(p, f32)
    diag_S = jnp.sum(S * eye_p, axis=1, keepdims=True)           # (p,1), loop-invariant
    row = lax.broadcasted_iota(jnp.int32, (n_iters, 1), 0)

    def beta_of(L, inv_psi):
        # Woodbury: L^T (Psi + L L^T)^{-1} = (I_k + L^T Psi^{-1} L)^{-1} L^T Psi^{-1}
        ipL = inv_psi * L                                        # Psi^{-1} L       (p, k)
        M = lax.dot_general(L, ipL, (((0,), (0,)), ((), ())),
                            preferred_element_type=f32)          # L^T Psi^{-1} L   (k, k)
        Ainv = _inv_small_kk(eye_k + M)
        beta = lax.dot_general(Ainv, ipL, (((1,), (1,)), ((), ())),
                               preferred_element_type=f32)       # (k, p)
        return beta, ipL

    def e_step(L, psi):
        beta, ipL = beta_of(L, 1.0 / psi)
        Syz = lax.dot_general(S, beta, (((1,), (1,)), ((), ())),
                              preferred_element_type=f32)        # S beta^T         (p, k)
        bL = jnp.dot(beta, L, preferred_element_type=f32)        # (k, k)
        bSbT = jnp.dot(beta, Syz, preferred_element_type=f32)    # beta S beta^T    (k, k)
        Ezz = n * (eye_k - bL) + bSbT
        return Syz, Ezz, ipL

    # Prologue: E-step statistics of the initial parameters (feed iteration 0).
    L0 = lam0_ref[...]
    psi0 = psi0_ref[...]
    Syz0, Ezz0, _ = e_step(L0, psi0)
    lam_ref[...] = L0
    psi_ref[...] = psi0
    syz_sc[...] = Syz0
    ezz_sc[...] = Ezz0
    nll_ref[...] = jnp.zeros_like(nll_ref)

    @pl.loop(0, n_iters)
    def _(i):
        L, psi = lam_ref[...], psi_ref[...]
        Syz, Ezz = syz_sc[...], ezz_sc[...]
        # ---- M-step (Ghahramani & Hinton 1996, eqs. 5-6) -----------------------
        L_new = jnp.dot(Syz, _inv_small_kk(Ezz), preferred_element_type=f32)   # (p, k)
        psi_new = (diag_S - jnp.sum(L_new * Syz, axis=1, keepdims=True)) / n
        # TODO(synk): Psi is not clamped positive (matches the PyTorch reference);
        # a degenerate fit can make 1/psi or log(psi) below non-finite.
        # ---- E-step with updated params (feeds both the NLL and the next iter) --
        Syz_n, Ezz_n, ipL_n = e_step(L_new, psi_new)
        # ---- NLL with updated params (Appendix A) -------------------------------
        inv_psi_n = 1.0 / psi_new
        A = 0.5 * jnp.sum(diag_S * inv_psi_n, keepdims=True)                   # (1, 1)
        B = jnp.sum(ipL_n * Syz_n, keepdims=True)            # tr(Psi^-1 L beta S)
        C = 0.5 * jnp.sum(
            L_new * jnp.dot(ipL_n, Ezz_n, preferred_element_type=f32),
            keepdims=True)                                   # tr(L^T Psi^-1 L Ezz)/2
        logdet = (-n / 2.0) * jnp.sum(jnp.log(psi_new), keepdims=True)
        nll = -(logdet - (A - B + C))
        # ---- carry state in VMEM (no per-iteration HBM round-trips) -------------
        lam_ref[...] = L_new
        psi_ref[...] = psi_new
        syz_sc[...] = Syz_n
        ezz_sc[...] = Ezz_n
        nll_ref[...] = jnp.where(row == i, nll, nll_ref[...])


def em_all(S, Lam0, Psi0_2d, n, n_iters):
    p, k = Lam0.shape
    return pl.pallas_call(
        functools.partial(_em_kernel, float(n), int(n_iters)),
        out_shape=(jax.ShapeDtypeStruct((p, k), jnp.float32),
                   jax.ShapeDtypeStruct((p, 1), jnp.float32),
                   jax.ShapeDtypeStruct((n_iters, 1), jnp.float32)),
        scratch_shapes=[pltpu.VMEM((p, k), jnp.float32),      # S beta^T carry
                        pltpu.VMEM((k, k), jnp.float32)],     # E[zz^T] carry
        compiler_params=pltpu.CompilerParams(vmem_limit_bytes=32 * 1024 * 1024),
    )(S, Lam0, Psi0_2d)


# ------------------------------------------------------------------------------
# Jitted driver: one Gram pass + one fused EM kernel.
# ------------------------------------------------------------------------------
@functools.partial(jax.jit, static_argnames=("n_iters",))
def pcca_em(y, Lam0, Psi0_diag, n_iters):
    _, n = y.shape
    S = gram(y)                                               # Pallas hot path
    Lam, Psi2d, nll = em_all(S, Lam0, Psi0_diag[:, None], n, n_iters)
    return Lam, Psi2d[:, 0], nll[:, 0]


# ------------------------------------------------------------------------------
# PCCAVec wrapper (parameter tiling / untiling, attribute updates).
# ------------------------------------------------------------------------------
class PCCAVecPallas:
    def __init__(self, latent_dim, dims, n_iters, key):
        self.latent_dim = latent_dim
        self.n_iters = n_iters
        self.p1, self.p2 = dims
        k1, k2 = jax.random.split(key)
        # init_params(): Lambda ~ N(0, 1), Psi_diag = 1.
        self.Lambda1 = jax.random.normal(k1, (self.p1, latent_dim), jnp.float32)
        self.Lambda2 = jax.random.normal(k2, (self.p2, latent_dim), jnp.float32)
        self.Psi1_diag = jnp.ones((self.p1,), jnp.float32)
        self.Psi2_diag = jnp.ones((self.p2,), jnp.float32)
        self.nlls = []

    def tile_params(self):
        return (jnp.concatenate([self.Lambda1, self.Lambda2], axis=0),
                jnp.concatenate([self.Psi1_diag, self.Psi2_diag], axis=0))

    def forward(self, y):
        Lam0, Psi0 = self.tile_params()
        Lam, Psi, nlls = pcca_em(y, Lam0, Psi0, self.n_iters)
        p1 = self.p1
        self.Lambda1 = Lam[:p1]
        self.Lambda2 = Lam[p1:]
        self.Psi1_diag = Psi[:p1]
        self.Psi2_diag = Psi[p1:]
        self.nlls = [float(v) for v in nlls]
        return Lam, Psi, nlls


# ------------------------------------------------------------------------------
# Pure-JAX reference (same math, dense p x p inverse as in the PyTorch module).
# ------------------------------------------------------------------------------
def _reference_em(S, Lam0, Psi0_diag, n, n_iters):
    k = Lam0.shape[1]
    I_k = jnp.eye(k, dtype=jnp.float32)

    def beta_of(L, Pd):
        return L.T @ jnp.linalg.inv(jnp.diag(Pd) + L @ L.T)

    Lam, Psi = Lam0, Psi0_diag
    nlls = []
    for _ in range(n_iters):
        beta = beta_of(Lam, Psi)
        Syz = S @ beta.T
        Ezz = n * (I_k - beta @ Lam) + beta @ Syz
        Lam = Syz @ jnp.linalg.inv(Ezz)
        Psi = (jnp.diag(S) - jnp.sum(Lam * Syz, axis=1)) / n
        bn = beta_of(Lam, Psi)
        inv_psi = 1.0 / Psi
        SbT = S @ bn.T
        A = 0.5 * jnp.sum(jnp.diag(S) * inv_psi)
        B = jnp.sum((inv_psi[:, None] * Lam) * SbT)
        Ezz_n = n * (I_k - bn @ Lam) + bn @ SbT
        C = 0.5 * jnp.sum(Lam * ((inv_psi[:, None] * Lam) @ Ezz_n))
        logdet = -n / 2.0 * jnp.sum(jnp.log(Psi))
        nlls.append(-(logdet - (A - B + C)))
    return Lam, Psi, jnp.stack(nlls)


if __name__ == "__main__":
    key = jax.random.PRNGKey(0)
    k_param, k_data = jax.random.split(key)

    # Small shapes consistent with the module: p1 + p2 dims, n samples, k latents.
    # n = 300 is deliberately ragged (not a multiple of 128) to exercise the
    # in-kernel tail masking of the Gram pass.
    p1, p2, latent_dim, n_iters = 8, 24, 4, 3
    n = 300

    model = PCCAVecPallas(latent_dim, (p1, p2), n_iters, k_param)
    Lam0, Psi0 = model.tile_params()                      # keep the init for the ref check
    y = jax.random.normal(k_data, (p1 + p2, n), jnp.float32)   # (p, n)

    Lam, Psi, nlls = model.forward(y)
    jax.block_until_ready((Lam, Psi, nlls))

    # --- Sanity 1: Pallas Gram kernel matches its (bf16-quantized, f32-acc) reference.
    S = jax.block_until_ready(gram(y))
    yb = y.astype(GRAM_COMPUTE_DTYPE).astype(jnp.float32)
    assert jnp.allclose(S, yb @ yb.T, rtol=2e-3, atol=5e-2), "Gram mismatch"

    # --- Sanity 2: fused EM kernel matches a plain-JAX EM on the same S.
    Lam_ref, Psi_ref, nlls_ref = _reference_em(S, Lam0, Psi0, n, n_iters)
    assert jnp.allclose(Lam, Lam_ref, rtol=2e-2, atol=2e-2), "Lambda mismatch"
    assert jnp.allclose(Psi, Psi_ref, rtol=2e-2, atol=2e-2), "Psi mismatch"
    assert jnp.allclose(nlls, nlls_ref, rtol=1e-2, atol=5.0), "NLL mismatch"
    assert bool(jnp.all(jnp.isfinite(nlls))), "non-finite NLL"

    print("KERNEL_OK")
</pallas_src>

<mosaic_0001>
module attributes {stable_mosaic.version = 11 : i64} {
  func.func @_gram_kernel(%arg0: i32, %arg1: i32, %arg2: memref<32x256xf32, #tpu.memory_space<vmem>>, %arg3: memref<1x32x32xf32, #tpu.memory_space<vmem>>) attributes {dimension_semantics = [#tpu.dimension_semantics<parallel>, #tpu.dimension_semantics<arbitrary>], iteration_bounds = array<i64: 1, 2>, scalar_prefetch = 0 : i64, scratch_operands = 0 : i64, tpu.core_type = #tpu.core_type<tc>, window_params = [{transform_indices = @transform_0, window_bounds = array<i64: 32, 256>}, {transform_indices = @transform_1, window_bounds = array<i64: 1, 32, 32>}]} {
    %c0_i32 = arith.constant 0 : i32
    %0 = arith.cmpi eq, %arg1, %c0_i32 : i32
    %1 = arith.extui %0 : i1 to i32
    %c0_i32_0 = arith.constant 0 : i32
    %2 = arith.cmpi ne, %1, %c0_i32_0 : i32
    scf.if %2 {
      %cst_9 = arith.constant 0.000000e+00 : f32
      %24 = vector.broadcast %cst_9 : f32 to vector<32x32xf32>
      %c0_10 = arith.constant 0 : index
      %c0_11 = arith.constant 0 : index
      %c0_12 = arith.constant 0 : index
      %25 = vector.load %arg3[%c0_10, %c0_11, %c0_12] : memref<1x32x32xf32, #tpu.memory_space<vmem>>, vector<1x32x32xf32>
      %26 = vector.shape_cast %25 : vector<1x32x32xf32> to vector<32x32xf32>
      %27 = vector.shape_cast %24 : vector<32x32xf32> to vector<1x32x32xf32>
      tpu.vector_store %arg3[%c0_10, %c0_11, %c0_12], %27 {strides = array<i32>} : memref<1x32x32xf32, #tpu.memory_space<vmem>>, vector<1x32x32xf32>,
    } else {
    }
    %c0 = arith.constant 0 : index
    %c0_1 = arith.constant 0 : index
    %3 = vector.load %arg2[%c0, %c0_1] : memref<32x256xf32, #tpu.memory_space<vmem>>, vector<32x256xf32>
    %c2_i32 = arith.constant 2 : i32
    %4 = arith.muli %arg0, %c2_i32 : i32
    %5 = arith.addi %4, %arg1 : i32
    %c256_i32 = arith.constant 256 : i32
    %6 = arith.muli %5, %c256_i32 : i32
    %7 = tpu.iota {dimensions = array<i32: 1>} : vector<1x256xi32>
    %8 = vector.broadcast %6 : i32 to vector<1x256xi32>
    %9 = arith.addi %8, %7 : vector<1x256xi32>
    %c300_i32 = arith.constant 300 : i32
    %10 = vector.broadcast %c300_i32 : i32 to vector<1x256xi32>
    %11 = arith.cmpi slt, %9, %10 : vector<1x256xi32>
    %cst = arith.constant 0.000000e+00 : f32
    %12 = vector.shape_cast %11 : vector<1x256xi1> to vector<1x256xi1>
    %13 = vector.broadcast %12 : vector<1x256xi1> to vector<32x256xi1>
    %14 = vector.broadcast %cst : f32 to vector<32x256xf32>
    %15 = arith.select %13, %3, %14 : vector<32x256xi1>, vector<32x256xf32>
    %16 = arith.truncf %15 : vector<32x256xf32> to vector<32x256xbf16>
    %c0_2 = arith.constant 0 : index
    %c0_3 = arith.constant 0 : index
    %c0_4 = arith.constant 0 : index
    %17 = vector.load %arg3[%c0_2, %c0_3, %c0_4] : memref<1x32x32xf32, #tpu.memory_space<vmem>>, vector<1x32x32xf32>
    %18 = vector.shape_cast %17 : vector<1x32x32xf32> to vector<32x32xf32>
    %cst_5 = arith.constant dense<0.000000e+00> : vector<32x32xf32>
    %19 = tpu.matmul %16, %16, %cst_5 {dimension_numbers = #tpu.dot_dimension_numbers<[1], [1], [0], [0], [0, 0, 1, 0], [], []>} : vector<32x256xbf16>, vector<32x256xbf16>, vector<32x32xf32> -> vector<32x32xf32>
    %20 = arith.addf %18, %19 : vector<32x32xf32>
    %c0_6 = arith.constant 0 : index
    %c0_7 = arith.constant 0 : index
    %c0_8 = arith.constant 0 : index
    %21 = vector.load %arg3[%c0_6, %c0_7, %c0_8] : memref<1x32x32xf32, #tpu.memory_space<vmem>>, vector<1x32x32xf32>
    %22 = vector.shape_cast %21 : vector<1x32x32xf32> to vector<32x32xf32>
    %23 = vector.shape_cast %20 : vector<32x32xf32> to vector<1x32x32xf32>
    tpu.vector_store %arg3[%c0_6, %c0_7, %c0_8], %23 {strides = array<i32>} : memref<1x32x32xf32, #tpu.memory_space<vmem>>, vector<1x32x32xf32>,
    return
  }
  func.func @transform_0(%arg0: i32, %arg1: i32) -> (i32, i32) {
    %c2_i32 = arith.constant 2 : i32
    %0 = arith.muli %arg0, %c2_i32 : i32
    %1 = arith.addi %0, %arg1 : i32
    %c1_i32 = arith.constant 1 : i32
    %2 = arith.minsi %1, %c1_i32 : i32
    %c0_i32 = arith.constant 0 : i32
    %c0_i32_0 = arith.constant 0 : i32
    return %c0_i32, %2 : i32, i32
  }
  func.func @transform_1(%arg0: i32, %arg1: i32) -> (i32, i32, i32) {
    %c0_i32 = arith.constant 0 : i32
    %c0_i32_0 = arith.constant 0 : i32
    %c0_i32_1 = arith.constant 0 : i32
    return %arg0, %c0_i32, %c0_i32_0 : i32, i32, i32
  }
}

module attributes {stable_mosaic.version = 11 : i64} {
  func.func @_em_kernel(%arg0: memref<32x32xf32, #tpu.memory_space<vmem>>, %arg1: memref<32x4xf32, #tpu.memory_space<vmem>>, %arg2: memref<32x1xf32, #tpu.memory_space<vmem>>, %arg3: memref<32x4xf32, #tpu.memory_space<vmem>>, %arg4: memref<32x1xf32, #tpu.memory_space<vmem>>, %arg5: memref<3x1xf32, #tpu.memory_space<vmem>>, %arg6: memref<32x4xf32, #tpu.memory_space<vmem>>, %arg7: memref<4x4xf32, #tpu.memory_space<vmem>>) attributes {dimension_semantics = [], scalar_prefetch = 0 : i64, scratch_operands = 2 : i64, tpu.core_type = #tpu.core_type<tc>} {
    %c0 = arith.constant 0 : index
    %c0_0 = arith.constant 0 : index
    %0 = vector.load %arg0[%c0, %c0_0] : memref<32x32xf32, #tpu.memory_space<vmem>>, vector<32x32xf32>
    %1 = tpu.iota {dimensions = array<i32: 0>} : vector<4x4xi32>
    %2 = tpu.iota {dimensions = array<i32: 1>} : vector<4x4xi32>
    %3 = arith.cmpi eq, %1, %2 : vector<4x4xi32>
    %4 = arith.extui %3 : vector<4x4xi1> to vector<4x4xi32>
    %5 = arith.sitofp %4 : vector<4x4xi32> to vector<4x4xf32>
    %6 = tpu.iota {dimensions = array<i32: 0>} : vector<32x32xi32>
    %7 = tpu.iota {dimensions = array<i32: 1>} : vector<32x32xi32>
    %8 = arith.cmpi eq, %6, %7 : vector<32x32xi32>
    %9 = arith.extui %8 : vector<32x32xi1> to vector<32x32xi32>
    %10 = arith.sitofp %9 : vector<32x32xi32> to vector<32x32xf32>
    %11 = arith.mulf %0, %10 : vector<32x32xf32>
    %cst = arith.constant dense<0.000000e+00> : vector<32xf32>
    %12 = vector.multi_reduction <add>, %11, %cst [1] : vector<32x32xf32> to vector<32xf32>
    %13 = vector.shape_cast %12 : vector<32xf32> to vector<32x1xf32>
    %14 = tpu.iota {dimensions = array<i32: 0>} : vector<3x1xi32>
    %c0_1 = arith.constant 0 : index
    %c0_2 = arith.constant 0 : index
    %15 = vector.load %arg1[%c0_1, %c0_2] : memref<32x4xf32, #tpu.memory_space<vmem>>, vector<32x4xf32>
    %c0_3 = arith.constant 0 : index
    %c0_4 = arith.constant 0 : index
    %16 = vector.load %arg2[%c0_3, %c0_4] : memref<32x1xf32, #tpu.memory_space<vmem>>, vector<32x1xf32>
    %cst_5 = arith.constant 1.000000e+00 : f32
    %17 = vector.broadcast %cst_5 : f32 to vector<32x1xf32>
    %18 = arith.divf %17, %16 : vector<32x1xf32>
    %19 = vector.broadcast %18 : vector<32x1xf32> to vector<32x4xf32>
    %20 = arith.mulf %19, %15 : vector<32x4xf32>
    %cst_6 = arith.constant dense<0.000000e+00> : vector<4x4xf32>
    %21 = tpu.matmul %15, %20, %cst_6 {dimension_numbers = #tpu.dot_dimension_numbers<[0], [0], [1], [1], [0, 1, 1, 1], [], []>} : vector<32x4xf32>, vector<32x4xf32>, vector<4x4xf32> -> vector<4x4xf32>
    %22 = arith.addf %5, %21 : vector<4x4xf32>
    %23 = tpu.iota {dimensions = array<i32: 0>} : vector<4x4xi32>
    %24 = tpu.iota {dimensions = array<i32: 1>} : vector<4x4xi32>
    %25 = arith.cmpi eq, %23, %24 : vector<4x4xi32>
    %26 = arith.extui %25 : vector<4x4xi1> to vector<4x4xi32>
    %27 = arith.sitofp %26 : vector<4x4xi32> to vector<4x4xf32>
    %c0_i32 = arith.constant 0 : i32
    %28 = vector.broadcast %c0_i32 : i32 to vector<4x4xi32>
    %29 = arith.cmpi eq, %23, %28 : vector<4x4xi32>
    %c0_i32_7 = arith.constant 0 : i32
    %30 = vector.broadcast %c0_i32_7 : i32 to vector<4x4xi32>
    %31 = arith.cmpi eq, %24, %30 : vector<4x4xi32>
    %32 = arith.andi %29, %31 : vector<4x4xi1>
    %cst_8 = arith.constant 0.000000e+00 : f32
    %33 = vector.broadcast %cst_8 : f32 to vector<4x4xf32>
    %34 = arith.select %32, %22, %33 : vector<4x4xi1>, vector<4x4xf32>
    %35 = vector.shape_cast %34 : vector<4x4xf32> to vector<1x4x4xf32>
    %cst_9 = arith.constant dense<0.000000e+00> : vector<1xf32>
    %36 = vector.multi_reduction <add>, %35, %cst_9 [1, 2] : vector<1x4x4xf32> to vector<1xf32>
    %37 = vector.shape_cast %36 : vector<1xf32> to vector<1x1x1xf32>
    %38 = vector.extract %37[0, 0, 0] : f32 from vector<1x1x1xf32>
    %39 = vector.broadcast %38 : f32 to vector<1x1xf32>
    %cst_10 = arith.constant 0.000000e+00 : f32
    %40 = vector.broadcast %cst_10 : f32 to vector<4x4xf32>
    %41 = arith.select %29, %22, %40 : vector<4x4xi1>, vector<4x4xf32>
    %cst_11 = arith.constant dense<0.000000e+00> : vector<4xf32>
    %42 = vector.multi_reduction <add>, %41, %cst_11 [0] : vector<4x4xf32> to vector<4xf32>
    %43 = vector.shape_cast %42 : vector<4xf32> to vector<1x4xf32>
    %44 = vector.broadcast %39 : vector<1x1xf32> to vector<1x4xf32>
    %45 = arith.divf %43, %44 : vector<1x4xf32>
    %cst_12 = arith.constant 0.000000e+00 : f32
    %46 = vector.broadcast %cst_12 : f32 to vector<4x4xf32>
    %47 = arith.select %29, %27, %46 : vector<4x4xi1>, vector<4x4xf32>
    %cst_13 = arith.constant dense<0.000000e+00> : vector<4xf32>
    %48 = vector.multi_reduction <add>, %47, %cst_13 [0] : vector<4x4xf32> to vector<4xf32>
    %49 = vector.shape_cast %48 : vector<4xf32> to vector<1x4xf32>
    %50 = vector.broadcast %39 : vector<1x1xf32> to vector<1x4xf32>
    %51 = arith.divf %49, %50 : vector<1x4xf32>
    %cst_14 = arith.constant 0.000000e+00 : f32
    %52 = vector.broadcast %cst_14 : f32 to vector<4x4xf32>
    %53 = arith.select %31, %22, %52 : vector<4x4xi1>, vector<4x4xf32>
    %cst_15 = arith.constant dense<0.000000e+00> : vector<4xf32>
    %54 = vector.multi_reduction <add>, %53, %cst_15 [1] : vector<4x4xf32> to vector<4xf32>
    %55 = vector.shape_cast %54 : vector<4xf32> to vector<4x1xf32>
    %56 = vector.shape_cast %45 : vector<1x4xf32> to vector<1x4xf32>
    %57 = vector.broadcast %56 : vector<1x4xf32> to vector<4x4xf32>
    %58 = vector.broadcast %55 : vector<4x1xf32> to vector<4x4xf32>
    %59 = vector.broadcast %45 : vector<1x4xf32> to vector<4x4xf32>
    %60 = arith.mulf %58, %59 : vector<4x4xf32>
    %61 = arith.subf %22, %60 : vector<4x4xf32>
    %62 = arith.select %29, %57, %61 : vector<4x4xi1>, vector<4x4xf32>
    %63 = vector.shape_cast %51 : vector<1x4xf32> to vector<1x4xf32>
    %64 = vector.broadcast %63 : vector<1x4xf32> to vector<4x4xf32>
    %65 = vector.broadcast %55 : vector<4x1xf32> to vector<4x4xf32>
    %66 = vector.broadcast %51 : vector<1x4xf32> to vector<4x4xf32>
    %67 = arith.mulf %65, %66 : vector<4x4xf32>
    %68 = arith.subf %27, %67 : vector<4x4xf32>
    %69 = arith.select %29, %64, %68 : vector<4x4xi1>, vector<4x4xf32>
    %c1_i32 = arith.constant 1 : i32
    %70 = vector.broadcast %c1_i32 : i32 to vector<4x4xi32>
    %71 = arith.cmpi eq, %23, %70 : vector<4x4xi32>
    %c1_i32_16 = arith.constant 1 : i32
    %72 = vector.broadcast %c1_i32_16 : i32 to vector<4x4xi32>
    %73 = arith.cmpi eq, %24, %72 : vector<4x4xi32>
    %74 = arith.andi %71, %73 : vector<4x4xi1>
    %cst_17 = arith.constant 0.000000e+00 : f32
    %75 = vector.broadcast %cst_17 : f32 to vector<4x4xf32>
    %76 = arith.select %74, %62, %75 : vector<4x4xi1>, vector<4x4xf32>
    %77 = vector.shape_cast %76 : vector<4x4xf32> to vector<1x4x4xf32>
    %cst_18 = arith.constant dense<0.000000e+00> : vector<1xf32>
    %78 = vector.multi_reduction <add>, %77, %cst_18 [1, 2] : vector<1x4x4xf32> to vector<1xf32>
    %79 = vector.shape_cast %78 : vector<1xf32> to vector<1x1x1xf32>
    %80 = vector.extract %79[0, 0, 0] : f32 from vector<1x1x1xf32>
    %81 = vector.broadcast %80 : f32 to vector<1x1xf32>
    %cst_19 = arith.constant 0.000000e+00 : f32
    %82 = vector.broadcast %cst_19 : f32 to vector<4x4xf32>
    %83 = arith.select %71, %62, %82 : vector<4x4xi1>, vector<4x4xf32>
    %cst_20 = arith.constant dense<0.000000e+00> : vector<4xf32>
    %84 = vector.multi_reduction <add>, %83, %cst_20 [0] : vector<4x4xf32> to vector<4xf32>
    %85 = vector.shape_cast %84 : vector<4xf32> to vector<1x4xf32>
    %86 = vector.broadcast %81 : vector<1x1xf32> to vector<1x4xf32>
    %87 = arith.divf %85, %86 : vector<1x4xf32>
    %cst_21 = arith.constant 0.000000e+00 : f32
    %88 = vector.broadcast %cst_21 : f32 to vector<4x4xf32>
    %89 = arith.select %71, %69, %88 : vector<4x4xi1>, vector<4x4xf32>
    %cst_22 = arith.constant dense<0.000000e+00> : vector<4xf32>
    %90 = vector.multi_reduction <add>, %89, %cst_22 [0] : vector<4x4xf32> to vector<4xf32>
    %91 = vector.shape_cast %90 : vector<4xf32> to vector<1x4xf32>
    %92 = vector.broadcast %81 : vector<1x1xf32> to vector<1x4xf32>
    %93 = arith.divf %91, %92 : vector<1x4xf32>
    %cst_23 = arith.constant 0.000000e+00 : f32
    %94 = vector.broadcast %cst_23 : f32 to vector<4x4xf32>
    %95 = arith.select %73, %62, %94 : vector<4x4xi1>, vector<4x4xf32>
    %cst_24 = arith.constant dense<0.000000e+00> : vector<4xf32>
    %96 = vector.multi_reduction <add>, %95, %cst_24 [1] : vector<4x4xf32> to vector<4xf32>
    %97 = vector.shape_cast %96 : vector<4xf32> to vector<4x1xf32>
    %98 = vector.shape_cast %87 : vector<1x4xf32> to vector<1x4xf32>
    %99 = vector.broadcast %98 : vector<1x4xf32> to vector<4x4xf32>
    %100 = vector.broadcast %97 : vector<4x1xf32> to vector<4x4xf32>
    %101 = vector.broadcast %87 : vector<1x4xf32> to vector<4x4xf32>
    %102 = arith.mulf %100, %101 : vector<4x4xf32>
    %103 = arith.subf %62, %102 : vector<4x4xf32>
    %104 = arith.select %71, %99, %103 : vector<4x4xi1>, vector<4x4xf32>
    %105 = vector.shape_cast %93 : vector<1x4xf32> to vector<1x4xf32>
    %106 = vector.broadcast %105 : vector<1x4xf32> to vector<4x4xf32>
    %107 = vector.broadcast %97 : vector<4x1xf32> to vector<4x4xf32>
    %108 = vector.broadcast %93 : vector<1x4xf32> to vector<4x4xf32>
    %109 = arith.mulf %107, %108 : vector<4x4xf32>
    %110 = arith.subf %69, %109 : vector<4x4xf32>
    %111 = arith.select %71, %106, %110 : vector<4x4xi1>, vector<4x4xf32>
    %c2_i32 = arith.constant 2 : i32
    %112 = vector.broadcast %c2_i32 : i32 to vector<4x4xi32>
    %113 = arith.cmpi eq, %23, %112 : vector<4x4xi32>
    %c2_i32_25 = arith.constant 2 : i32
    %114 = vector.broadcast %c2_i32_25 : i32 to vector<4x4xi32>
    %115 = arith.cmpi eq, %24, %114 : vector<4x4xi32>
    %116 = arith.andi %113, %115 : vector<4x4xi1>
    %cst_26 = arith.constant 0.000000e+00 : f32
    %117 = vector.broadcast %cst_26 : f32 to vector<4x4xf32>
    %118 = arith.select %116, %104, %117 : vector<4x4xi1>, vector<4x4xf32>
    %119 = vector.shape_cast %118 : vector<4x4xf32> to vector<1x4x4xf32>
    %cst_27 = arith.constant dense<0.000000e+00> : vector<1xf32>
    %120 = vector.multi_reduction <add>, %119, %cst_27 [1, 2] : vector<1x4x4xf32> to vector<1xf32>
    %121 = vector.shape_cast %120 : vector<1xf32> to vector<1x1x1xf32>
    %122 = vector.extract %121[0, 0, 0] : f32 from vector<1x1x1xf32>
    %123 = vector.broadcast %122 : f32 to vector<1x1xf32>
    %cst_28 = arith.constant 0.000000e+00 : f32
    %124 = vector.broadcast %cst_28 : f32 to vector<4x4xf32>
    %125 = arith.select %113, %104, %124 : vector<4x4xi1>, vector<4x4xf32>
    %cst_29 = arith.constant dense<0.000000e+00> : vector<4xf32>
    %126 = vector.multi_reduction <add>, %125, %cst_29 [0] : vector<4x4xf32> to vector<4xf32>
    %127 = vector.shape_cast %126 : vector<4xf32> to vector<1x4xf32>
    %128 = vector.broadcast %123 : vector<1x1xf32> to vector<1x4xf32>
    %129 = arith.divf %127, %128 : vector<1x4xf32>
    %cst_30 = arith.constant 0.000000e+00 : f32
    %130 = vector.broadcast %cst_30 : f32 to vector<4x4xf32>
    %131 = arith.select %113, %111, %130 : vector<4x4xi1>, vector<4x4xf32>
    %cst_31 = arith.constant dense<0.000000e+00> : vector<4xf32>
    %132 = vector.multi_reduction <add>, %131, %cst_31 [0] : vector<4x4xf32> to vector<4xf32>
    %133 = vector.shape_cast %132 : vector<4xf32> to vector<1x4xf32>
    %134 = vector.broadcast %123 : vector<1x1xf32> to vector<1x4xf32>
    %135 = arith.divf %133, %134 : vector<1x4xf32>
    %cst_32 = arith.constant 0.000000e+00 : f32
    %136 = vector.broadcast %cst_32 : f32 to vector<4x4xf32>
    %137 = arith.select %115, %104, %136 : vector<4x4xi1>, vector<4x4xf32>
    %cst_33 = arith.constant dense<0.000000e+00> : vector<4xf32>
    %138 = vector.multi_reduction <add>, %137, %cst_33 [1] : vector<4x4xf32> to vector<4xf32>
    %139 = vector.shape_cast %138 : vector<4xf32> to vector<4x1xf32>
    %140 = vector.shape_cast %129 : vector<1x4xf32> to vector<1x4xf32>
    %141 = vector.broadcast %140 : vector<1x4xf32> to vector<4x4xf32>
    %142 = vector.broadcast %139 : vector<4x1xf32> to vector<4x4xf32>
    %143 = vector.broadcast %129 : vector<1x4xf32> to vector<4x4xf32>
    %144 = arith.mulf %142, %143 : vector<4x4xf32>
    %145 = arith.subf %104, %144 : vector<4x4xf32>
    %146 = arith.select %113, %141, %145 : vector<4x4xi1>, vector<4x4xf32>
    %147 = vector.shape_cast %135 : vector<1x4xf32> to vector<1x4xf32>
    %148 = vector.broadcast %147 : vector<1x4xf32> to vector<4x4xf32>
    %149 = vector.broadcast %139 : vector<4x1xf32> to vector<4x4xf32>
    %150 = vector.broadcast %135 : vector<1x4xf32> to vector<4x4xf32>
    %151 = arith.mulf %149, %150 : vector<4x4xf32>
    %152 = arith.subf %111, %151 : vector<4x4xf32>
    %153 = arith.select %113, %148, %152 : vector<4x4xi1>, vector<4x4xf32>
    %c3_i32 = arith.constant 3 : i32
    %154 = vector.broadcast %c3_i32 : i32 to vector<4x4xi32>
    %155 = arith.cmpi eq, %23, %154 : vector<4x4xi32>
    %c3_i32_34 = arith.constant 3 : i32
    %156 = vector.broadcast %c3_i32_34 : i32 to vector<4x4xi32>
    %157 = arith.cmpi eq, %24, %156 : vector<4x4xi32>
    %158 = arith.andi %155, %157 : vector<4x4xi1>
    %cst_35 = arith.constant 0.000000e+00 : f32
    %159 = vector.broadcast %cst_35 : f32 to vector<4x4xf32>
    %160 = arith.select %158, %146, %159 : vector<4x4xi1>, vector<4x4xf32>
    %161 = vector.shape_cast %160 : vector<4x4xf32> to vector<1x4x4xf32>
    %cst_36 = arith.constant dense<0.000000e+00> : vector<1xf32>
    %162 = vector.multi_reduction <add>, %161, %cst_36 [1, 2] : vector<1x4x4xf32> to vector<1xf32>
    %163 = vector.shape_cast %162 : vector<1xf32> to vector<1x1x1xf32>
    %164 = vector.extract %163[0, 0, 0] : f32 from vector<1x1x1xf32>
    %165 = vector.broadcast %164 : f32 to vector<1x1xf32>
    %cst_37 = arith.constant 0.000000e+00 : f32
    %166 = vector.broadcast %cst_37 : f32 to vector<4x4xf32>
    %167 = arith.select %155, %153, %166 : vector<4x4xi1>, vector<4x4xf32>
    %cst_38 = arith.constant dense<0.000000e+00> : vector<4xf32>
    %168 = vector.multi_reduction <add>, %167, %cst_38 [0] : vector<4x4xf32> to vector<4xf32>
    %169 = vector.shape_cast %168 : vector<4xf32> to vector<1x4xf32>
    %170 = vector.broadcast %165 : vector<1x1xf32> to vector<1x4xf32>
    %171 = arith.divf %169, %170 : vector<1x4xf32>
    %cst_39 = arith.constant 0.000000e+00 : f32
    %172 = vector.broadcast %cst_39 : f32 to vector<4x4xf32>
    %173 = arith.select %157, %146, %172 : vector<4x4xi1>, vector<4x4xf32>
    %cst_40 = arith.constant dense<0.000000e+00> : vector<4xf32>
    %174 = vector.multi_reduction <add>, %173, %cst_40 [1] : vector<4x4xf32> to vector<4xf32>
    %175 = vector.shape_cast %174 : vector<4xf32> to vector<4x1xf32>
    %176 = vector.shape_cast %171 : vector<1x4xf32> to vector<1x4xf32>
    %177 = vector.broadcast %176 : vector<1x4xf32> to vector<4x4xf32>
    %178 = vector.broadcast %175 : vector<4x1xf32> to vector<4x4xf32>
    %179 = vector.broadcast %171 : vector<1x4xf32> to vector<4x4xf32>
    %180 = arith.mulf %178, %179 : vector<4x4xf32>
    %181 = arith.subf %153, %180 : vector<4x4xf32>
    %182 = arith.select %155, %177, %181 : vector<4x4xi1>, vector<4x4xf32>
    %cst_41 = arith.constant dense<0.000000e+00> : vector<4x32xf32>
    %183 = tpu.matmul %182, %20, %cst_41 {dimension_numbers = #tpu.dot_dimension_numbers<[1], [1], [0], [0], [0, 0, 1, 0], [], []>} : vector<4x4xf32>, vector<32x4xf32>, vector<4x32xf32> -> vector<4x32xf32>
    %cst_42 = arith.constant dense<0.000000e+00> : vector<32x4xf32>
    %184 = tpu.matmul %0, %183, %cst_42 {dimension_numbers = #tpu.dot_dimension_numbers<[1], [1], [0], [0], [0, 0, 1, 0], [], []>} : vector<32x32xf32>, vector<4x32xf32>, vector<32x4xf32> -> vector<32x4xf32>
    %cst_43 = arith.constant dense<0.000000e+00> : vector<4x4xf32>
    %185 = tpu.matmul %183, %15, %cst_43 {dimension_numbers = #tpu.dot_dimension_numbers<[1], [0], [0], [1], [0, 0, 1, 1], [], []>} : vector<4x32xf32>, vector<32x4xf32>, vector<4x4xf32> -> vector<4x4xf32>
    %cst_44 = arith.constant dense<0.000000e+00> : vector<4x4xf32>
    %186 = tpu.matmul %183, %184, %cst_44 {dimension_numbers = #tpu.dot_dimension_numbers<[1], [0], [0], [1], [0, 0, 1, 1], [], []>} : vector<4x32xf32>, vector<32x4xf32>, vector<4x4xf32> -> vector<4x4xf32>
    %187 = arith.subf %5, %185 : vector<4x4xf32>
    %cst_45 = arith.constant 3.000000e+02 : f32
    %188 = vector.broadcast %cst_45 : f32 to vector<4x4xf32>
    %189 = arith.mulf %188, %187 : vector<4x4xf32>
    %190 = arith.addf %189, %186 : vector<4x4xf32>
    %c0_46 = arith.constant 0 : index
    %c0_47 = arith.constant 0 : index
    %191 = vector.load %arg3[%c0_46, %c0_47] : memref<32x4xf32, #tpu.memory_space<vmem>>, vector<32x4xf32>
    tpu.vector_store %arg3[%c0_46, %c0_47], %15 {strides = array<i32>} : memref<32x4xf32, #tpu.memory_space<vmem>>, vector<32x4xf32>,
    %c0_48 = arith.constant 0 : index
    %c0_49 = arith.constant 0 : index
    %192 = vector.load %arg4[%c0_48, %c0_49] : memref<32x1xf32, #tpu.memory_space<vmem>>, vector<32x1xf32>
    tpu.vector_store %arg4[%c0_48, %c0_49], %16 {strides = array<i32>} : memref<32x1xf32, #tpu.memory_space<vmem>>, vector<32x1xf32>,
    %c0_50 = arith.constant 0 : index
    %c0_51 = arith.constant 0 : index
    %193 = vector.load %arg6[%c0_50, %c0_51] : memref<32x4xf32, #tpu.memory_space<vmem>>, vector<32x4xf32>
    tpu.vector_store %arg6[%c0_50, %c0_51], %184 {strides = array<i32>} : memref<32x4xf32, #tpu.memory_space<vmem>>, vector<32x4xf32>,
    %c0_52 = arith.constant 0 : index
    %c0_53 = arith.constant 0 : index
    %194 = vector.load %arg7[%c0_52, %c0_53] : memref<4x4xf32, #tpu.memory_space<vmem>>, vector<4x4xf32>
    tpu.vector_store %arg7[%c0_52, %c0_53], %190 {strides = array<i32>} : memref<4x4xf32, #tpu.memory_space<vmem>>, vector<4x4xf32>,
    %cst_54 = arith.constant 0.000000e+00 : f32
    %195 = vector.broadcast %cst_54 : f32 to vector<3x1xf32>
    %c0_55 = arith.constant 0 : index
    %c0_56 = arith.constant 0 : index
    %196 = vector.load %arg5[%c0_55, %c0_56] : memref<3x1xf32, #tpu.memory_space<vmem>>, vector<3x1xf32>
    tpu.vector_store %arg5[%c0_55, %c0_56], %195 {strides = array<i32>} : memref<3x1xf32, #tpu.memory_space<vmem>>, vector<3x1xf32>,
    %c0_i32_57 = arith.constant 0 : i32
    %c3_i32_58 = arith.constant 3 : i32
    %197 = arith.addi %c0_i32_57, %c3_i32_58 : i32
    %c1_i32_59 = arith.constant 1 : i32
    scf.for %arg8 = %c0_i32_57 to %197 step %c1_i32_59  : i32 {
      %c1_i32_61 = arith.constant 1 : i32
      %198 = arith.muli %arg8, %c1_i32_61 : i32
      %c0_i32_62 = arith.constant 0 : i32
      %199 = arith.addi %c0_i32_62, %198 : i32
      %c0_63 = arith.constant 0 : index
      %c0_64 = arith.constant 0 : index
      %200 = vector.load %arg6[%c0_63, %c0_64] : memref<32x4xf32, #tpu.memory_space<vmem>>, vector<32x4xf32>
      %c0_65 = arith.constant 0 : index
      %c0_66 = arith.constant 0 : index
      %201 = vector.load %arg7[%c0_65, %c0_66] : memref<4x4xf32, #tpu.memory_space<vmem>>, vector<4x4xf32>
      %202 = tpu.iota {dimensions = array<i32: 0>} : vector<4x4xi32>
      %203 = tpu.iota {dimensions = array<i32: 1>} : vector<4x4xi32>
      %204 = arith.cmpi eq, %202, %203 : vector<4x4xi32>
      %205 = arith.extui %204 : vector<4x4xi1> to vector<4x4xi32>
      %206 = arith.sitofp %205 : vector<4x4xi32> to vector<4x4xf32>
      %c0_i32_67 = arith.constant 0 : i32
      %207 = vector.broadcast %c0_i32_67 : i32 to vector<4x4xi32>
      %208 = arith.cmpi eq, %202, %207 : vector<4x4xi32>
      %c0_i32_68 = arith.constant 0 : i32
      %209 = vector.broadcast %c0_i32_68 : i32 to vector<4x4xi32>
      %210 = arith.cmpi eq, %203, %209 : vector<4x4xi32>
      %211 = arith.andi %208, %210 : vector<4x4xi1>
      %cst_69 = arith.constant 0.000000e+00 : f32
      %212 = vector.broadcast %cst_69 : f32 to vector<4x4xf32>
      %213 = arith.select %211, %201, %212 : vector<4x4xi1>, vector<4x4xf32>
      %214 = vector.shape_cast %213 : vector<4x4xf32> to vector<1x4x4xf32>
      %cst_70 = arith.constant dense<0.000000e+00> : vector<1xf32>
      %215 = vector.multi_reduction <add>, %214, %cst_70 [1, 2] : vector<1x4x4xf32> to vector<1xf32>
      %216 = vector.shape_cast %215 : vector<1xf32> to vector<1x1x1xf32>
      %217 = vector.extract %216[0, 0, 0] : f32 from vector<1x1x1xf32>
      %218 = vector.broadcast %217 : f32 to vector<1x1xf32>
      %cst_71 = arith.constant 0.000000e+00 : f32
      %219 = vector.broadcast %cst_71 : f32 to vector<4x4xf32>
      %220 = arith.select %208, %201, %219 : vector<4x4xi1>, vector<4x4xf32>
      %cst_72 = arith.constant dense<0.000000e+00> : vector<4xf32>
      %221 = vector.multi_reduction <add>, %220, %cst_72 [0] : vector<4x4xf32> to vector<4xf32>
      %222 = vector.shape_cast %221 : vector<4xf32> to vector<1x4xf32>
      %223 = vector.broadcast %218 : vector<1x1xf32> to vector<1x4xf32>
      %224 = arith.divf %222, %223 : vector<1x4xf32>
      %cst_73 = arith.constant 0.000000e+00 : f32
      %225 = vector.broadcast %cst_73 : f32 to vector<4x4xf32>
      %226 = arith.select %208, %206, %225 : vector<4x4xi1>, vector<4x4xf32>
      %cst_74 = arith.constant dense<0.000000e+00> : vector<4xf32>
      %227 = vector.multi_reduction <add>, %226, %cst_74 [0] : vector<4x4xf32> to vector<4xf32>
      %228 = vector.shape_cast %227 : vector<4xf32> to vector<1x4xf32>
      %229 = vector.broadcast %218 : vector<1x1xf32> to vector<1x4xf32>
      %230 = arith.divf %228, %229 : vector<1x4xf32>
      %cst_75 = arith.constant 0.000000e+00 : f32
      %231 = vector.broadcast %cst_75 : f32 to vector<4x4xf32>
      %232 = arith.select %210, %201, %231 : vector<4x4xi1>, vector<4x4xf32>
      %cst_76 = arith.constant dense<0.000000e+00> : vector<4xf32>
      %233 = vector.multi_reduction <add>, %232, %cst_76 [1] : vector<4x4xf32> to vector<4xf32>
      %234 = vector.shape_cast %233 : vector<4xf32> to vector<4x1xf32>
      %235 = vector.shape_cast %224 : vector<1x4xf32> to vector<1x4xf32>
      %236 = vector.broadcast %235 : vector<1x4xf32> to vector<4x4xf32>
      %237 = vector.broadcast %234 : vector<4x1xf32> to vector<4x4xf32>
      %238 = vector.broadcast %224 : vector<1x4xf32> to vector<4x4xf32>
      %239 = arith.mulf %237, %238 : vector<4x4xf32>
      %240 = arith.subf %201, %239 : vector<4x4xf32>
      %241 = arith.select %208, %236, %240 : vector<4x4xi1>, vector<4x4xf32>
      %242 = vector.shape_cast %230 : vector<1x4xf32> to vector<1x4xf32>
      %243 = vector.broadcast %242 : vector<1x4xf32> to vector<4x4xf32>
      %244 = vector.broadcast %234 : vector<4x1xf32> to vector<4x4xf32>
      %245 = vector.broadcast %230 : vector<1x4xf32> to vector<4x4xf32>
      %246 = arith.mulf %244, %245 : vector<4x4xf32>
      %247 = arith.subf %206, %246 : vector<4x4xf32>
      %248 = arith.select %208, %243, %247 : vector<4x4xi1>, vector<4x4xf32>
      %c1_i32_77 = arith.constant 1 : i32
      %249 = vector.broadcast %c1_i32_77 : i32 to vector<4x4xi32>
      %250 = arith.cmpi eq, %202, %249 : vector<4x4xi32>
      %c1_i32_78 = arith.constant 1 : i32
      %251 = vector.broadcast %c1_i32_78 : i32 to vector<4x4xi32>
      %252 = arith.cmpi eq, %203, %251 : vector<4x4xi32>
      %253 = arith.andi %250, %252 : vector<4x4xi1>
      %cst_79 = arith.constant 0.000000e+00 : f32
      %254 = vector.broadcast %cst_79 : f32 to vector<4x4xf32>
      %255 = arith.select %253, %241, %254 : vector<4x4xi1>, vector<4x4xf32>
      %256 = vector.shape_cast %255 : vector<4x4xf32> to vector<1x4x4xf32>
      %cst_80 = arith.constant dense<0.000000e+00> : vector<1xf32>
      %257 = vector.multi_reduction <add>, %256, %cst_80 [1, 2] : vector<1x4x4xf32> to vector<1xf32>
      %258 = vector.shape_cast %257 : vector<1xf32> to vector<1x1x1xf32>
      %259 = vector.extract %258[0, 0, 0] : f32 from vector<1x1x1xf32>
      %260 = vector.broadcast %259 : f32 to vector<1x1xf32>
      %cst_81 = arith.constant 0.000000e+00 : f32
      %261 = vector.broadcast %cst_81 : f32 to vector<4x4xf32>
      %262 = arith.select %250, %241, %261 : vector<4x4xi1>, vector<4x4xf32>
      %cst_82 = arith.constant dense<0.000000e+00> : vector<4xf32>
      %263 = vector.multi_reduction <add>, %262, %cst_82 [0] : vector<4x4xf32> to vector<4xf32>
      %264 = vector.shape_cast %263 : vector<4xf32> to vector<1x4xf32>
      %265 = vector.broadcast %260 : vector<1x1xf32> to vector<1x4xf32>
      %266 = arith.divf %264, %265 : vector<1x4xf32>
      %cst_83 = arith.constant 0.000000e+00 : f32
      %267 = vector.broadcast %cst_83 : f32 to vector<4x4xf32>
      %268 = arith.select %250, %248, %267 : vector<4x4xi1>, vector<4x4xf32>
      %cst_84 = arith.constant dense<0.000000e+00> : vector<4xf32>
      %269 = vector.multi_reduction <add>, %268, %cst_84 [0] : vector<4x4xf32> to vector<4xf32>
      %270 = vector.shape_cast %269 : vector<4xf32> to vector<1x4xf32>
      %271 = vector.broadcast %260 : vector<1x1xf32> to vector<1x4xf32>
      %272 = arith.divf %270, %271 : vector<1x4xf32>
      %cst_85 = arith.constant 0.000000e+00 : f32
      %273 = vector.broadcast %cst_85 : f32 to vector<4x4xf32>
      %274 = arith.select %252, %241, %273 : vector<4x4xi1>, vector<4x4xf32>
      %cst_86 = arith.constant dense<0.000000e+00> : vector<4xf32>
      %275 = vector.multi_reduction <add>, %274, %cst_86 [1] : vector<4x4xf32> to vector<4xf32>
      %276 = vector.shape_cast %275 : vector<4xf32> to vector<4x1xf32>
      %277 = vector.shape_cast %266 : vector<1x4xf32> to vector<1x4xf32>
      %278 = vector.broadcast %277 : vector<1x4xf32> to vector<4x4xf32>
      %279 = vector.broadcast %276 : vector<4x1xf32> to vector<4x4xf32>
      %280 = vector.broadcast %266 : vector<1x4xf32> to vector<4x4xf32>
      %281 = arith.mulf %279, %280 : vector<4x4xf32>
      %282 = arith.subf %241, %281 : vector<4x4xf32>
      %283 = arith.select %250, %278, %282 : vector<4x4xi1>, vector<4x4xf32>
      %284 = vector.shape_cast %272 : vector<1x4xf32> to vector<1x4xf32>
      %285 = vector.broadcast %284 : vector<1x4xf32> to vector<4x4xf32>
      %286 = vector.broadcast %276 : vector<4x1xf32> to vector<4x4xf32>
      %287 = vector.broadcast %272 : vector<1x4xf32> to vector<4x4xf32>
      %288 = arith.mulf %286, %287 : vector<4x4xf32>
      %289 = arith.subf %248, %288 : vector<4x4xf32>
      %290 = arith.select %250, %285, %289 : vector<4x4xi1>, vector<4x4xf32>
      %c2_i32_87 = arith.constant 2 : i32
      %291 = vector.broadcast %c2_i32_87 : i32 to vector<4x4xi32>
      %292 = arith.cmpi eq, %202, %291 : vector<4x4xi32>
      %c2_i32_88 = arith.constant 2 : i32
      %293 = vector.broadcast %c2_i32_88 : i32 to vector<4x4xi32>
      %294 = arith.cmpi eq, %203, %293 : vector<4x4xi32>
      %295 = arith.andi %292, %294 : vector<4x4xi1>
      %cst_89 = arith.constant 0.000000e+00 : f32
      %296 = vector.broadcast %cst_89 : f32 to vector<4x4xf32>
      %297 = arith.select %295, %283, %296 : vector<4x4xi1>, vector<4x4xf32>
      %298 = vector.shape_cast %297 : vector<4x4xf32> to vector<1x4x4xf32>
      %cst_90 = arith.constant dense<0.000000e+00> : vector<1xf32>
      %299 = vector.multi_reduction <add>, %298, %cst_90 [1, 2] : vector<1x4x4xf32> to vector<1xf32>
      %300 = vector.shape_cast %299 : vector<1xf32> to vector<1x1x1xf32>
      %301 = vector.extract %300[0, 0, 0] : f32 from vector<1x1x1xf32>
      %302 = vector.broadcast %301 : f32 to vector<1x1xf32>
      %cst_91 = arith.constant 0.000000e+00 : f32
      %303 = vector.broadcast %cst_91 : f32 to vector<4x4xf32>
      %304 = arith.select %292, %283, %303 : vector<4x4xi1>, vector<4x4xf32>
      %cst_92 = arith.constant dense<0.000000e+00> : vector<4xf32>
      %305 = vector.multi_reduction <add>, %304, %cst_92 [0] : vector<4x4xf32> to vector<4xf32>
      %306 = vector.shape_cast %305 : vector<4xf32> to vector<1x4xf32>
      %307 = vector.broadcast %302 : vector<1x1xf32> to vector<1x4xf32>
      %308 = arith.divf %306, %307 : vector<1x4xf32>
      %cst_93 = arith.constant 0.000000e+00 : f32
      %309 = vector.broadcast %cst_93 : f32 to vector<4x4xf32>
      %310 = arith.select %292, %290, %309 : vector<4x4xi1>, vector<4x4xf32>
      %cst_94 = arith.constant dense<0.000000e+00> : vector<4xf32>
      %311 = vector.multi_reduction <add>, %310, %cst_94 [0] : vector<4x4xf32> to vector<4xf32>
      %312 = vector.shape_cast %311 : vector<4xf32> to vector<1x4xf32>
      %313 = vector.broadcast %302 : vector<1x1xf32> to vector<1x4xf32>
      %314 = arith.divf %312, %313 : vector<1x4xf32>
      %cst_95 = arith.constant 0.000000e+00 : f32
      %315 = vector.broadcast %cst_95 : f32 to vector<4x4xf32>
      %316 = arith.select %294, %283, %315 : vector<4x4xi1>, vector<4x4xf32>
      %cst_96 = arith.constant dense<0.000000e+00> : vector<4xf32>
      %317 = vector.multi_reduction <add>, %316, %cst_96 [1] : vector<4x4xf32> to vector<4xf32>
      %318 = vector.shape_cast %317 : vector<4xf32> to vector<4x1xf32>
      %319 = vector.shape_cast %308 : vector<1x4xf32> to vector<1x4xf32>
      %320 = vector.broadcast %319 : vector<1x4xf32> to vector<4x4xf32>
      %321 = vector.broadcast %318 : vector<4x1xf32> to vector<4x4xf32>
      %322 = vector.broadcast %308 : vector<1x4xf32> to vector<4x4xf32>
      %323 = arith.mulf %321, %322 : vector<4x4xf32>
      %324 = arith.subf %283, %323 : vector<4x4xf32>
      %325 = arith.select %292, %320, %324 : vector<4x4xi1>, vector<4x4xf32>
      %326 = vector.shape_cast %314 : vector<1x4xf32> to vector<1x4xf32>
      %327 = vector.broadcast %326 : vector<1x4xf32> to vector<4x4xf32>
      %328 = vector.broadcast %318 : vector<4x1xf32> to vector<4x4xf32>
      %329 = vector.broadcast %314 : vector<1x4xf32> to vector<4x4xf32>
      %330 = arith.mulf %328, %329 : vector<4x4xf32>
      %331 = arith.subf %290, %330 : vector<4x4xf32>
      %332 = arith.select %292, %327, %331 : vector<4x4xi1>, vector<4x4xf32>
      %c3_i32_97 = arith.constant 3 : i32
      %333 = vector.broadcast %c3_i32_97 : i32 to vector<4x4xi32>
      %334 = arith.cmpi eq, %202, %333 : vector<4x4xi32>
      %c3_i32_98 = arith.constant 3 : i32
      %335 = vector.broadcast %c3_i32_98 : i32 to vector<4x4xi32>
      %336 = arith.cmpi eq, %203, %335 : vector<4x4xi32>
      %337 = arith.andi %334, %336 : vector<4x4xi1>
      %cst_99 = arith.constant 0.000000e+00 : f32
      %338 = vector.broadcast %cst_99 : f32 to vector<4x4xf32>
      %339 = arith.select %337, %325, %338 : vector<4x4xi1>, vector<4x4xf32>
      %340 = vector.shape_cast %339 : vector<4x4xf32> to vector<1x4x4xf32>
      %cst_100 = arith.constant dense<0.000000e+00> : vector<1xf32>
      %341 = vector.multi_reduction <add>, %340, %cst_100 [1, 2] : vector<1x4x4xf32> to vector<1xf32>
      %342 = vector.shape_cast %341 : vector<1xf32> to vector<1x1x1xf32>
      %343 = vector.extract %342[0, 0, 0] : f32 from vector<1x1x1xf32>
      %344 = vector.broadcast %343 : f32 to vector<1x1xf32>
      %cst_101 = arith.constant 0.000000e+00 : f32
      %345 = vector.broadcast %cst_101 : f32 to vector<4x4xf32>
      %346 = arith.select %334, %332, %345 : vector<4x4xi1>, vector<4x4xf32>
      %cst_102 = arith.constant dense<0.000000e+00> : vector<4xf32>
      %347 = vector.multi_reduction <add>, %346, %cst_102 [0] : vector<4x4xf32> to vector<4xf32>
      %348 = vector.shape_cast %347 : vector<4xf32> to vector<1x4xf32>
      %349 = vector.broadcast %344 : vector<1x1xf32> to vector<1x4xf32>
      %350 = arith.divf %348, %349 : vector<1x4xf32>
      %cst_103 = arith.constant 0.000000e+00 : f32
      %351 = vector.broadcast %cst_103 : f32 to vector<4x4xf32>
      %352 = arith.select %336, %325, %351 : vector<4x4xi1>, vector<4x4xf32>
      %cst_104 = arith.constant dense<0.000000e+00> : vector<4xf32>
      %353 = vector.multi_reduction <add>, %352, %cst_104 [1] : vector<4x4xf32> to vector<4xf32>
      %354 = vector.shape_cast %353 : vector<4xf32> to vector<4x1xf32>
      %355 = vector.shape_cast %350 : vector<1x4xf32> to vector<1x4xf32>
      %356 = vector.broadcast %355 : vector<1x4xf32> to vector<4x4xf32>
      %357 = vector.broadcast %354 : vector<4x1xf32> to vector<4x4xf32>
      %358 = vector.broadcast %350 : vector<1x4xf32> to vector<4x4xf32>
      %359 = arith.mulf %357, %358 : vector<4x4xf32>
      %360 = arith.subf %332, %359 : vector<4x4xf32>
      %361 = arith.select %334, %356, %360 : vector<4x4xi1>, vector<4x4xf32>
      %cst_105 = arith.constant dense<0.000000e+00> : vector<32x4xf32>
      %362 = tpu.matmul %200, %361, %cst_105 {dimension_numbers = #tpu.dot_dimension_numbers<[1], [0], [0], [1], [0, 0, 1, 1], [], []>} : vector<32x4xf32>, vector<4x4xf32>, vector<32x4xf32> -> vector<32x4xf32>
      %363 = arith.mulf %362, %200 : vector<32x4xf32>
      %cst_106 = arith.constant dense<0.000000e+00> : vector<32xf32>
      %364 = vector.multi_reduction <add>, %363, %cst_106 [1] : vector<32x4xf32> to vector<32xf32>
      %365 = vector.shape_cast %364 : vector<32xf32> to vector<32x1xf32>
      %366 = arith.subf %13, %365 : vector<32x1xf32>
      %cst_107 = arith.constant 3.000000e+02 : f32
      %367 = vector.broadcast %cst_107 : f32 to vector<32x1xf32>
      %368 = arith.divf %366, %367 : vector<32x1xf32>
      %cst_108 = arith.constant 1.000000e+00 : f32
      %369 = vector.broadcast %cst_108 : f32 to vector<32x1xf32>
      %370 = arith.divf %369, %368 : vector<32x1xf32>
      %371 = vector.broadcast %370 : vector<32x1xf32> to vector<32x4xf32>
      %372 = arith.mulf %371, %362 : vector<32x4xf32>
      %cst_109 = arith.constant dense<0.000000e+00> : vector<4x4xf32>
      %373 = tpu.matmul %362, %372, %cst_109 {dimension_numbers = #tpu.dot_dimension_numbers<[0], [0], [1], [1], [0, 1, 1, 1], [], []>} : vector<32x4xf32>, vector<32x4xf32>, vector<4x4xf32> -> vector<4x4xf32>
      %374 = arith.addf %5, %373 : vector<4x4xf32>
      %375 = tpu.iota {dimensions = array<i32: 0>} : vector<4x4xi32>
      %376 = tpu.iota {dimensions = array<i32: 1>} : vector<4x4xi32>
      %377 = arith.cmpi eq, %375, %376 : vector<4x4xi32>
      %378 = arith.extui %377 : vector<4x4xi1> to vector<4x4xi32>
      %379 = arith.sitofp %378 : vector<4x4xi32> to vector<4x4xf32>
      %c0_i32_110 = arith.constant 0 : i32
      %380 = vector.broadcast %c0_i32_110 : i32 to vector<4x4xi32>
      %381 = arith.cmpi eq, %375, %380 : vector<4x4xi32>
      %c0_i32_111 = arith.constant 0 : i32
      %382 = vector.broadcast %c0_i32_111 : i32 to vector<4x4xi32>
      %383 = arith.cmpi eq, %376, %382 : vector<4x4xi32>
      %384 = arith.andi %381, %383 : vector<4x4xi1>
      %cst_112 = arith.constant 0.000000e+00 : f32
      %385 = vector.broadcast %cst_112 : f32 to vector<4x4xf32>
      %386 = arith.select %384, %374, %385 : vector<4x4xi1>, vector<4x4xf32>
      %387 = vector.shape_cast %386 : vector<4x4xf32> to vector<1x4x4xf32>
      %cst_113 = arith.constant dense<0.000000e+00> : vector<1xf32>
      %388 = vector.multi_reduction <add>, %387, %cst_113 [1, 2] : vector<1x4x4xf32> to vector<1xf32>
      %389 = vector.shape_cast %388 : vector<1xf32> to vector<1x1x1xf32>
      %390 = vector.extract %389[0, 0, 0] : f32 from vector<1x1x1xf32>
      %391 = vector.broadcast %390 : f32 to vector<1x1xf32>
      %cst_114 = arith.constant 0.000000e+00 : f32
      %392 = vector.broadcast %cst_114 : f32 to vector<4x4xf32>
      %393 = arith.select %381, %374, %392 : vector<4x4xi1>, vector<4x4xf32>
      %cst_115 = arith.constant dense<0.000000e+00> : vector<4xf32>
      %394 = vector.multi_reduction <add>, %393, %cst_115 [0] : vector<4x4xf32> to vector<4xf32>
      %395 = vector.shape_cast %394 : vector<4xf32> to vector<1x4xf32>
      %396 = vector.broadcast %391 : vector<1x1xf32> to vector<1x4xf32>
      %397 = arith.divf %395, %396 : vector<1x4xf32>
      %cst_116 = arith.constant 0.000000e+00 : f32
      %398 = vector.broadcast %cst_116 : f32 to vector<4x4xf32>
      %399 = arith.select %381, %379, %398 : vector<4x4xi1>, vector<4x4xf32>
      %cst_117 = arith.constant dense<0.000000e+00> : vector<4xf32>
      %400 = vector.multi_reduction <add>, %399, %cst_117 [0] : vector<4x4xf32> to vector<4xf32>
      %401 = vector.shape_cast %400 : vector<4xf32> to vector<1x4xf32>
      %402 = vector.broadcast %391 : vector<1x1xf32> to vector<1x4xf32>
      %403 = arith.divf %401, %402 : vector<1x4xf32>
      %cst_118 = arith.constant 0.000000e+00 : f32
      %404 = vector.broadcast %cst_118 : f32 to vector<4x4xf32>
      %405 = arith.select %383, %374, %404 : vector<4x4xi1>, vector<4x4xf32>
      %cst_119 = arith.constant dense<0.000000e+00> : vector<4xf32>
      %406 = vector.multi_reduction <add>, %405, %cst_119 [1] : vector<4x4xf32> to vector<4xf32>
      %407 = vector.shape_cast %406 : vector<4xf32> to vector<4x1xf32>
      %408 = vector.shape_cast %397 : vector<1x4xf32> to vector<1x4xf32>
      %409 = vector.broadcast %408 : vector<1x4xf32> to vector<4x4xf32>
      %410 = vector.broadcast %407 : vector<4x1xf32> to vector<4x4xf32>
      %411 = vector.broadcast %397 : vector<1x4xf32> to vector<4x4xf32>
      %412 = arith.mulf %410, %411 : vector<4x4xf32>
      %413 = arith.subf %374, %412 : vector<4x4xf32>
      %414 = arith.select %381, %409, %413 : vector<4x4xi1>, vector<4x4xf32>
      %415 = vector.shape_cast %403 : vector<1x4xf32> to vector<1x4xf32>
      %416 = vector.broadcast %415 : vector<1x4xf32> to vector<4x4xf32>
      %417 = vector.broadcast %407 : vector<4x1xf32> to vector<4x4xf32>
      %418 = vector.broadcast %403 : vector<1x4xf32> to vector<4x4xf32>
      %419 = arith.mulf %417, %418 : vector<4x4xf32>
      %420 = arith.subf %379, %419 : vector<4x4xf32>
      %421 = arith.select %381, %416, %420 : vector<4x4xi1>, vector<4x4xf32>
      %c1_i32_120 = arith.constant 1 : i32
      %422 = vector.broadcast %c1_i32_120 : i32 to vector<4x4xi32>
      %423 = arith.cmpi eq, %375, %422 : vector<4x4xi32>
      %c1_i32_121 = arith.constant 1 : i32
      %424 = vector.broadcast %c1_i32_121 : i32 to vector<4x4xi32>
      %425 = arith.cmpi eq, %376, %424 : vector<4x4xi32>
      %426 = arith.andi %423, %425 : vector<4x4xi1>
      %cst_122 = arith.constant 0.000000e+00 : f32
      %427 = vector.broadcast %cst_122 : f32 to vector<4x4xf32>
      %428 = arith.select %426, %414, %427 : vector<4x4xi1>, vector<4x4xf32>
      %429 = vector.shape_cast %428 : vector<4x4xf32> to vector<1x4x4xf32>
      %cst_123 = arith.constant dense<0.000000e+00> : vector<1xf32>
      %430 = vector.multi_reduction <add>, %429, %cst_123 [1, 2] : vector<1x4x4xf32> to vector<1xf32>
      %431 = vector.shape_cast %430 : vector<1xf32> to vector<1x1x1xf32>
      %432 = vector.extract %431[0, 0, 0] : f32 from vector<1x1x1xf32>
      %433 = vector.broadcast %432 : f32 to vector<1x1xf32>
      %cst_124 = arith.constant 0.000000e+00 : f32
      %434 = vector.broadcast %cst_124 : f32 to vector<4x4xf32>
      %435 = arith.select %423, %414, %434 : vector<4x4xi1>, vector<4x4xf32>
      %cst_125 = arith.constant dense<0.000000e+00> : vector<4xf32>
      %436 = vector.multi_reduction <add>, %435, %cst_125 [0] : vector<4x4xf32> to vector<4xf32>
      %437 = vector.shape_cast %436 : vector<4xf32> to vector<1x4xf32>
      %438 = vector.broadcast %433 : vector<1x1xf32> to vector<1x4xf32>
      %439 = arith.divf %437, %438 : vector<1x4xf32>
      %cst_126 = arith.constant 0.000000e+00 : f32
      %440 = vector.broadcast %cst_126 : f32 to vector<4x4xf32>
      %441 = arith.select %423, %421, %440 : vector<4x4xi1>, vector<4x4xf32>
      %cst_127 = arith.constant dense<0.000000e+00> : vector<4xf32>
      %442 = vector.multi_reduction <add>, %441, %cst_127 [0] : vector<4x4xf32> to vector<4xf32>
      %443 = vector.shape_cast %442 : vector<4xf32> to vector<1x4xf32>
      %444 = vector.broadcast %433 : vector<1x1xf32> to vector<1x4xf32>
      %445 = arith.divf %443, %444 : vector<1x4xf32>
      %cst_128 = arith.constant 0.000000e+00 : f32
      %446 = vector.broadcast %cst_128 : f32 to vector<4x4xf32>
      %447 = arith.select %425, %414, %446 : vector<4x4xi1>, vector<4x4xf32>
      %cst_129 = arith.constant dense<0.000000e+00> : vector<4xf32>
      %448 = vector.multi_reduction <add>, %447, %cst_129 [1] : vector<4x4xf32> to vector<4xf32>
      %449 = vector.shape_cast %448 : vector<4xf32> to vector<4x1xf32>
      %450 = vector.shape_cast %439 : vector<1x4xf32> to vector<1x4xf32>
      %451 = vector.broadcast %450 : vector<1x4xf32> to vector<4x4xf32>
      %452 = vector.broadcast %449 : vector<4x1xf32> to vector<4x4xf32>
      %453 = vector.broadcast %439 : vector<1x4xf32> to vector<4x4xf32>
      %454 = arith.mulf %452, %453 : vector<4x4xf32>
      %455 = arith.subf %414, %454 : vector<4x4xf32>
      %456 = arith.select %423, %451, %455 : vector<4x4xi1>, vector<4x4xf32>
      %457 = vector.shape_cast %445 : vector<1x4xf32> to vector<1x4xf32>
      %458 = vector.broadcast %457 : vector<1x4xf32> to vector<4x4xf32>
      %459 = vector.broadcast %449 : vector<4x1xf32> to vector<4x4xf32>
      %460 = vector.broadcast %445 : vector<1x4xf32> to vector<4x4xf32>
      %461 = arith.mulf %459, %460 : vector<4x4xf32>
      %462 = arith.subf %421, %461 : vector<4x4xf32>
      %463 = arith.select %423, %458, %462 : vector<4x4xi1>, vector<4x4xf32>
      %c2_i32_130 = arith.constant 2 : i32
      %464 = vector.broadcast %c2_i32_130 : i32 to vector<4x4xi32>
      %465 = arith.cmpi eq, %375, %464 : vector<4x4xi32>
      %c2_i32_131 = arith.constant 2 : i32
      %466 = vector.broadcast %c2_i32_131 : i32 to vector<4x4xi32>
      %467 = arith.cmpi eq, %376, %466 : vector<4x4xi32>
      %468 = arith.andi %465, %467 : vector<4x4xi1>
      %cst_132 = arith.constant 0.000000e+00 : f32
      %469 = vector.broadcast %cst_132 : f32 to vector<4x4xf32>
      %470 = arith.select %468, %456, %469 : vector<4x4xi1>, vector<4x4xf32>
      %471 = vector.shape_cast %470 : vector<4x4xf32> to vector<1x4x4xf32>
      %cst_133 = arith.constant dense<0.000000e+00> : vector<1xf32>
      %472 = vector.multi_reduction <add>, %471, %cst_133 [1, 2] : vector<1x4x4xf32> to vector<1xf32>
      %473 = vector.shape_cast %472 : vector<1xf32> to vector<1x1x1xf32>
      %474 = vector.extract %473[0, 0, 0] : f32 from vector<1x1x1xf32>
      %475 = vector.broadcast %474 : f32 to vector<1x1xf32>
      %cst_134 = arith.constant 0.000000e+00 : f32
      %476 = vector.broadcast %cst_134 : f32 to vector<4x4xf32>
      %477 = arith.select %465, %456, %476 : vector<4x4xi1>, vector<4x4xf32>
      %cst_135 = arith.constant dense<0.000000e+00> : vector<4xf32>
      %478 = vector.multi_reduction <add>, %477, %cst_135 [0] : vector<4x4xf32> to vector<4xf32>
      %479 = vector.shape_cast %478 : vector<4xf32> to vector<1x4xf32>
      %480 = vector.broadcast %475 : vector<1x1xf32> to vector<1x4xf32>
      %481 = arith.divf %479, %480 : vector<1x4xf32>
      %cst_136 = arith.constant 0.000000e+00 : f32
      %482 = vector.broadcast %cst_136 : f32 to vector<4x4xf32>
      %483 = arith.select %465, %463, %482 : vector<4x4xi1>, vector<4x4xf32>
      %cst_137 = arith.constant dense<0.000000e+00> : vector<4xf32>
      %484 = vector.multi_reduction <add>, %483, %cst_137 [0] : vector<4x4xf32> to vector<4xf32>
      %485 = vector.shape_cast %484 : vector<4xf32> to vector<1x4xf32>
      %486 = vector.broadcast %475 : vector<1x1xf32> to vector<1x4xf32>
      %487 = arith.divf %485, %486 : vector<1x4xf32>
      %cst_138 = arith.constant 0.000000e+00 : f32
      %488 = vector.broadcast %cst_138 : f32 to vector<4x4xf32>
      %489 = arith.select %467, %456, %488 : vector<4x4xi1>, vector<4x4xf32>
      %cst_139 = arith.constant dense<0.000000e+00> : vector<4xf32>
      %490 = vector.multi_reduction <add>, %489, %cst_139 [1] : vector<4x4xf32> to vector<4xf32>
      %491 = vector.shape_cast %490 : vector<4xf32> to vector<4x1xf32>
      %492 = vector.shape_cast %481 : vector<1x4xf32> to vector<1x4xf32>
      %493 = vector.broadcast %492 : vector<1x4xf32> to vector<4x4xf32>
      %494 = vector.broadcast %491 : vector<4x1xf32> to vector<4x4xf32>
      %495 = vector.broadcast %481 : vector<1x4xf32> to vector<4x4xf32>
      %496 = arith.mulf %494, %495 : vector<4x4xf32>
      %497 = arith.subf %456, %496 : vector<4x4xf32>
      %498 = arith.select %465, %493, %497 : vector<4x4xi1>, vector<4x4xf32>
      %499 = vector.shape_cast %487 : vector<1x4xf32> to vector<1x4xf32>
      %500 = vector.broadcast %499 : vector<1x4xf32> to vector<4x4xf32>
      %501 = vector.broadcast %491 : vector<4x1xf32> to vector<4x4xf32>
      %502 = vector.broadcast %487 : vector<1x4xf32> to vector<4x4xf32>
      %503 = arith.mulf %501, %502 : vector<4x4xf32>
      %504 = arith.subf %463, %503 : vector<4x4xf32>
      %505 = arith.select %465, %500, %504 : vector<4x4xi1>, vector<4x4xf32>
      %c3_i32_140 = arith.constant 3 : i32
      %506 = vector.broadcast %c3_i32_140 : i32 to vector<4x4xi32>
      %507 = arith.cmpi eq, %375, %506 : vector<4x4xi32>
      %c3_i32_141 = arith.constant 3 : i32
      %508 = vector.broadcast %c3_i32_141 : i32 to vector<4x4xi32>
      %509 = arith.cmpi eq, %376, %508 : vector<4x4xi32>
      %510 = arith.andi %507, %509 : vector<4x4xi1>
      %cst_142 = arith.constant 0.000000e+00 : f32
      %511 = vector.broadcast %cst_142 : f32 to vector<4x4xf32>
      %512 = arith.select %510, %498, %511 : vector<4x4xi1>, vector<4x4xf32>
      %513 = vector.shape_cast %512 : vector<4x4xf32> to vector<1x4x4xf32>
      %cst_143 = arith.constant dense<0.000000e+00> : vector<1xf32>
      %514 = vector.multi_reduction <add>, %513, %cst_143 [1, 2] : vector<1x4x4xf32> to vector<1xf32>
      %515 = vector.shape_cast %514 : vector<1xf32> to vector<1x1x1xf32>
      %516 = vector.extract %515[0, 0, 0] : f32 from vector<1x1x1xf32>
      %517 = vector.broadcast %516 : f32 to vector<1x1xf32>
      %cst_144 = arith.constant 0.000000e+00 : f32
      %518 = vector.broadcast %cst_144 : f32 to vector<4x4xf32>
      %519 = arith.select %507, %505, %518 : vector<4x4xi1>, vector<4x4xf32>
      %cst_145 = arith.constant dense<0.000000e+00> : vector<4xf32>
      %520 = vector.multi_reduction <add>, %519, %cst_145 [0] : vector<4x4xf32> to vector<4xf32>
      %521 = vector.shape_cast %520 : vector<4xf32> to vector<1x4xf32>
      %522 = vector.broadcast %517 : vector<1x1xf32> to vector<1x4xf32>
      %523 = arith.divf %521, %522 : vector<1x4xf32>
      %cst_146 = arith.constant 0.000000e+00 : f32
      %524 = vector.broadcast %cst_146 : f32 to vector<4x4xf32>
      %525 = arith.select %509, %498, %524 : vector<4x4xi1>, vector<4x4xf32>
      %cst_147 = arith.constant dense<0.000000e+00> : vector<4xf32>
      %526 = vector.multi_reduction <add>, %525, %cst_147 [1] : vector<4x4xf32> to vector<4xf32>
      %527 = vector.shape_cast %526 : vector<4xf32> to vector<4x1xf32>
      %528 = vector.shape_cast %523 : vector<1x4xf32> to vector<1x4xf32>
      %529 = vector.broadcast %528 : vector<1x4xf32> to vector<4x4xf32>
      %530 = vector.broadcast %527 : vector<4x1xf32> to vector<4x4xf32>
      %531 = vector.broadcast %523 : vector<1x4xf32> to vector<4x4xf32>
      %532 = arith.mulf %530, %531 : vector<4x4xf32>
      %533 = arith.subf %505, %532 : vector<4x4xf32>
      %534 = arith.select %507, %529, %533 : vector<4x4xi1>, vector<4x4xf32>
      %cst_148 = arith.constant dense<0.000000e+00> : vector<4x32xf32>
      %535 = tpu.matmul %534, %372, %cst_148 {dimension_numbers = #tpu.dot_dimension_numbers<[1], [1], [0], [0], [0, 0, 1, 0], [], []>} : vector<4x4xf32>, vector<32x4xf32>, vector<4x32xf32> -> vector<4x32xf32>
      %cst_149 = arith.constant dense<0.000000e+00> : vector<32x4xf32>
      %536 = tpu.matmul %0, %535, %cst_149 {dimension_numbers = #tpu.dot_dimension_numbers<[1], [1], [0], [0], [0, 0, 1, 0], [], []>} : vector<32x32xf32>, vector<4x32xf32>, vector<32x4xf32> -> vector<32x4xf32>
      %cst_150 = arith.constant dense<0.000000e+00> : vector<4x4xf32>
      %537 = tpu.matmul %535, %362, %cst_150 {dimension_numbers = #tpu.dot_dimension_numbers<[1], [0], [0], [1], [0, 0, 1, 1], [], []>} : vector<4x32xf32>, vector<32x4xf32>, vector<4x4xf32> -> vector<4x4xf32>
      %cst_151 = arith.constant dense<0.000000e+00> : vector<4x4xf32>
      %538 = tpu.matmul %535, %536, %cst_151 {dimension_numbers = #tpu.dot_dimension_numbers<[1], [0], [0], [1], [0, 0, 1, 1], [], []>} : vector<4x32xf32>, vector<32x4xf32>, vector<4x4xf32> -> vector<4x4xf32>
      %539 = arith.subf %5, %537 : vector<4x4xf32>
      %cst_152 = arith.constant 3.000000e+02 : f32
      %540 = vector.broadcast %cst_152 : f32 to vector<4x4xf32>
      %541 = arith.mulf %540, %539 : vector<4x4xf32>
      %542 = arith.addf %541, %538 : vector<4x4xf32>
      %cst_153 = arith.constant 1.000000e+00 : f32
      %543 = vector.broadcast %cst_153 : f32 to vector<32x1xf32>
      %544 = arith.divf %543, %368 : vector<32x1xf32>
      %545 = arith.mulf %13, %544 : vector<32x1xf32>
      %546 = vector.shape_cast %545 : vector<32x1xf32> to vector<1x32x1xf32>
      %cst_154 = arith.constant dense<0.000000e+00> : vector<1xf32>
      %547 = vector.multi_reduction <add>, %546, %cst_154 [1, 2] : vector<1x32x1xf32> to vector<1xf32>
      %548 = vector.shape_cast %547 : vector<1xf32> to vector<1x1x1xf32>
      %549 = vector.extract %548[0, 0, 0] : f32 from vector<1x1x1xf32>
      %550 = vector.broadcast %549 : f32 to vector<1x1xf32>
      %cst_155 = arith.constant 5.000000e-01 : f32
      %551 = vector.broadcast %cst_155 : f32 to vector<1x1xf32>
      %552 = arith.mulf %551, %550 : vector<1x1xf32>
      %553 = arith.mulf %372, %536 : vector<32x4xf32>
      %554 = vector.shape_cast %553 : vector<32x4xf32> to vector<1x32x4xf32>
      %cst_156 = arith.constant dense<0.000000e+00> : vector<1xf32>
      %555 = vector.multi_reduction <add>, %554, %cst_156 [1, 2] : vector<1x32x4xf32> to vector<1xf32>
      %556 = vector.shape_cast %555 : vector<1xf32> to vector<1x1x1xf32>
      %557 = vector.extract %556[0, 0, 0] : f32 from vector<1x1x1xf32>
      %558 = vector.broadcast %557 : f32 to vector<1x1xf32>
      %cst_157 = arith.constant dense<0.000000e+00> : vector<32x4xf32>
      %559 = tpu.matmul %372, %542, %cst_157 {dimension_numbers = #tpu.dot_dimension_numbers<[1], [0], [0], [1], [0, 0, 1, 1], [], []>} : vector<32x4xf32>, vector<4x4xf32>, vector<32x4xf32> -> vector<32x4xf32>
      %560 = arith.mulf %362, %559 : vector<32x4xf32>
      %561 = vector.shape_cast %560 : vector<32x4xf32> to vector<1x32x4xf32>
      %cst_158 = arith.constant dense<0.000000e+00> : vector<1xf32>
      %562 = vector.multi_reduction <add>, %561, %cst_158 [1, 2] : vector<1x32x4xf32> to vector<1xf32>
      %563 = vector.shape_cast %562 : vector<1xf32> to vector<1x1x1xf32>
      %564 = vector.extract %563[0, 0, 0] : f32 from vector<1x1x1xf32>
      %565 = vector.broadcast %564 : f32 to vector<1x1xf32>
      %cst_159 = arith.constant 5.000000e-01 : f32
      %566 = vector.broadcast %cst_159 : f32 to vector<1x1xf32>
      %567 = arith.mulf %566, %565 : vector<1x1xf32>
      %568 = math.log %368 : vector<32x1xf32>
      %569 = vector.shape_cast %568 : vector<32x1xf32> to vector<1x32x1xf32>
      %cst_160 = arith.constant dense<0.000000e+00> : vector<1xf32>
      %570 = vector.multi_reduction <add>, %569, %cst_160 [1, 2] : vector<1x32x1xf32> to vector<1xf32>
      %571 = vector.shape_cast %570 : vector<1xf32> to vector<1x1x1xf32>
      %572 = vector.extract %571[0, 0, 0] : f32 from vector<1x1x1xf32>
      %573 = vector.broadcast %572 : f32 to vector<1x1xf32>
      %cst_161 = arith.constant -1.500000e+02 : f32
      %574 = vector.broadcast %cst_161 : f32 to vector<1x1xf32>
      %575 = arith.mulf %574, %573 : vector<1x1xf32>
      %576 = arith.subf %552, %558 : vector<1x1xf32>
      %577 = arith.addf %576, %567 : vector<1x1xf32>
      %578 = arith.subf %575, %577 : vector<1x1xf32>
      %cst_162 = arith.constant 0.000000e+00 : f32
      %579 = vector.broadcast %cst_162 : f32 to vector<1x1xf32>
      %580 = arith.subf %579, %578 : vector<1x1xf32>
      %c0_163 = arith.constant 0 : index
      %c0_164 = arith.constant 0 : index
      %581 = vector.load %arg3[%c0_163, %c0_164] : memref<32x4xf32, #tpu.memory_space<vmem>>, vector<32x4xf32>
      tpu.vector_store %arg3[%c0_163, %c0_164], %362 {strides = array<i32>} : memref<32x4xf32, #tpu.memory_space<vmem>>, vector<32x4xf32>,
      %c0_165 = arith.constant 0 : index
      %c0_166 = arith.constant 0 : index
      %582 = vector.load %arg4[%c0_165, %c0_166] : memref<32x1xf32, #tpu.memory_space<vmem>>, vector<32x1xf32>
      tpu.vector_store %arg4[%c0_165, %c0_166], %368 {strides = array<i32>} : memref<32x1xf32, #tpu.memory_space<vmem>>, vector<32x1xf32>,
      %c0_167 = arith.constant 0 : index
      %c0_168 = arith.constant 0 : index
      %583 = vector.load %arg6[%c0_167, %c0_168] : memref<32x4xf32, #tpu.memory_space<vmem>>, vector<32x4xf32>
      tpu.vector_store %arg6[%c0_167, %c0_168], %536 {strides = array<i32>} : memref<32x4xf32, #tpu.memory_space<vmem>>, vector<32x4xf32>,
      %c0_169 = arith.constant 0 : index
      %c0_170 = arith.constant 0 : index
      %584 = vector.load %arg7[%c0_169, %c0_170] : memref<4x4xf32, #tpu.memory_space<vmem>>, vector<4x4xf32>
      tpu.vector_store %arg7[%c0_169, %c0_170], %542 {strides = array<i32>} : memref<4x4xf32, #tpu.memory_space<vmem>>, vector<4x4xf32>,
      %585 = vector.broadcast %199 : i32 to vector<3x1xi32>
      %586 = arith.cmpi eq, %14, %585 : vector<3x1xi32>
      %c0_171 = arith.constant 0 : index
      %c0_172 = arith.constant 0 : index
      %587 = vector.load %arg5[%c0_171, %c0_172] : memref<3x1xf32, #tpu.memory_space<vmem>>, vector<3x1xf32>
      %588 = vector.shape_cast %580 : vector<1x1xf32> to vector<1x1xf32>
      %589 = vector.broadcast %588 : vector<1x1xf32> to vector<3x1xf32>
      %590 = arith.select %586, %589, %587 : vector<3x1xi1>, vector<3x1xf32>
      %c0_173 = arith.constant 0 : index
      %c0_174 = arith.constant 0 : index
      %591 = vector.load %arg5[%c0_173, %c0_174] : memref<3x1xf32, #tpu.memory_space<vmem>>, vector<3x1xf32>
      tpu.vector_store %arg5[%c0_173, %c0_174], %590 {strides = array<i32>} : memref<3x1xf32, #tpu.memory_space<vmem>>, vector<3x1xf32>,
    }
    %c3_i32_60 = arith.constant 3 : i32
    return
  }
}

</mosaic_0001>

<bundles_post_ra>
// kernel: pcca_em.2
= control target key start
LH: loop header
LB: loop body
LE: loop exit
PB: predicated region body
PF: predicated region fallthrough
CT: control target
= control target key end

     0   :  { %6 = vsyncpa [#allocation3], 0  ;;  %s744_s0 = inlined_call_operand.hbm [shape: f32[32,300], index: 0, kind: input, shape index: {}]   ;;  %s745_s1 = inlined_call_operand.vmem [shape: f32[1,32,32], index: 1, kind: output, shape index: {}]  }
   0x1   :  { %8 = vsyncpa [#allocation3 + $0x1], 0  ;;  %s551_s6 = smov 0   ;;  %s553_s7 = smov 0  }
   0x2   :  { %s555_s8 = smov 0   ;;  %s557_s9 = smov 0  }
   0x3   :  { %s559_s10 = smov 0   ;;  %s561_s11 = smov 0  }
   0x4 LB: > { %s23_s12 = sadd.s32 1, %s531_s10  ;;  %p32_p1 = scmp.lt.s32.totalorder %s531_s10, 1  ;;  %s535_s11 = sphi %s561_s11, %s14_s11   ;;  %s531_s10 = sphi %s559_s10, %s753_s10   ;;  %s527_s9 = sphi %s557_s9, %s752_s9   ;;  %s523_s8 = sphi %s555_s8, %s751_s8   ;;  %s519_s7 = sphi %s553_s7, %s750_s7   ;;  %s515_s6 = sphi %s551_s6, %s749_s6  }
   0x5   : > { %p24_p0 = scmp.ge.s32.totalorder %s23_s12, 2  ;;  %s356_s13 = sadd.s32 4294967295, %s535_s11  }
   0x6   : > { %p48_p2 = scmp.ne.s32.totalorder %s523_s8, %s519_s7  ;;  %p49_p4 = scmp.eq.s32.totalorder %s535_s11, 0 }
   0x7   : > { %s755_s12 = smov (%p24_p0, %s23_s12), 0  ;;  %p54_p5 = scmp.ne.s32.totalorder %s519_s7, %s515_s6 }
   0x8   : > { %s587_s14 = scalar_select %p32_p1, %s531_s10, 1 }
   0x9   : > { %p36_p3 = scmp.lt.s32.totalorder %s755_s12, 1  ;;  %p55_p6 = scmp.eq.s32.totalorder %s356_s13, 0 }
   0xa   : > { %p50_p7 = por %p49_p4, %p48_p2  ;;  %s41_s18 = sadd.s32 1, %s523_s8 }
   0xb   : > { %s37_s15 = scalar_select %p36_p3, %s755_s12, 1 }
   0xc   : > { %p593_p8 = por %p55_p6, %p54_p5  ;;  %p358_p10 = scmp.ge.s32.totalorder %s535_s11, 2 }
   0xd   : > { %s38_s17 = ssub.s32 %s587_s14, %s37_s15 }
   0xe   : > { %p39_p9 = scmp.eq.s32.totalorder %s38_s17, 0  ;;  %100 = sbr.rel (%p358_p10) target bundleno = 56 (0x38), region = 16 }
  0x10   : > { %s600_s19 = scalar_select %p39_p9, %s523_s8, %s41_s18  }
  0x15   : > { %103 = sbr.rel (!%p50_p7) target bundleno = 56 (0x38), region = 20  ;;  %s104_s20 = sand.u32 (%p50_p7), 1, %s523_s8  }
  0x16   : > { %s360_s21 = sshll.u32 (%p50_p7), %s587_s14, 1  ;;  %s359_s22 = sshll.u32 (%p50_p7), %s104_s20, 6 }
  0x17   : > { %s114_s23 = ssub.s32 (%p50_p7), 3, %s360_s21  ;;  %s611_s26 = scalar_lea.sflag (%p50_p7), [#allocation3], %s104_s20 }
  0x18   : > { %p115_p11 = scmp.lt.s32.totalorder (%p50_p7), %s114_s23, 2  ;;  %s108_s27 = scalar_lea.vmem (%p50_p7), [#allocation2], %s359_s22 }
  0x1c   : > { %s757_s23 = smov (!%p115_p11, %s114_s23), 2 }
  0x1d   : > { %s608_s24 = sshll.u32 %s757_s23, 9 }
  0x1e   : > { %s119_s25 = ssub.s32 1024, %s608_s24 }
  0x1f   : > { %120 = vsyncadd %s611_s26, %s119_s25  ;;  %p362_p12 = scmp.ne.s32.totalorder %s608_s24, 0  ;;  %s398_s28 = sshll.u32 %s587_s14, 8 }
  0x20   : > { %s619_s2 = scalar_lea.hbm %s744_s0, %s398_s28  ;;  %s364_s3 = sshll.u32 %s757_s23, 3 }
  0x21   : > { %s126_s4 = sshll.u32 %s108_s27, 4  ;;  %s457_s5 = scalar_lea.hbm %s619_s2, %s608_s24  ;;  %s622_s4 = int_to_ptr.vmem [resolvable:$true] %s126_s4 }
  0x22   : > { %p458_p13 = scmp.ne.s32.totalorder %s619_s2, %s457_s5  ;;  %s461_s14 = scalar_lea.hbm %s744_s0, 1536 }
  0x23   : > { %p462_p2 = scmp.lt.u32.totalorder %s619_s2, %s744_s0  ;;  %p463_p3 = scmp.lt.u32.totalorder %s461_s14, %s457_s5 }
  0x24   : > { %p459_p0 = pnand %p458_p13, %p362_p12  ;;  %p465_p5 = scmp.lt.u32.totalorder %s457_s5, %s619_s2 }
  0x25   : > { %p464_p4 = por %p463_p3, %p462_p2 }
  0x26   : > { %p460_p1 = pneg %p459_p0 }
  0x27   : > { %p466_p6 = por %p465_p5, %p464_p4 }
  0x29   : > { %p467_p7 = pnand %p466_p6, %p460_p1 }
  0x2b   : > { %470 = shalt.err (!%p467_p7)
}
  0x2c   : > { %s471_s18 = scalar_lea.vmem %s622_s4, %s608_s24  ;;  %s537_s20 = smov [#allocation2]  }
  0x2d   : > { %p472_p9 = scmp.ne.s32.totalorder %s622_s4, %s471_s18  ;;  %s475_s21 = sshll.u32 %s537_s20, 4  ;;  %s476_s21 = int_to_ptr.vmem [resolvable:$false] %s475_s21 }
  0x2e   : > { %s477_s22 = scalar_lea.vmem %s476_s21, 2048  ;;  %p478_p13 = scmp.lt.s32.totalorder %s622_s4, %s476_s21 }
  0x2f   : > { %p473_p10 = pnand %p472_p9, %p362_p12  ;;  %p479_p0 = scmp.lt.s32.totalorder %s477_s22, %s471_s18 }
  0x31   : > { %p474_p11 = pneg %p473_p10  ;;  %p480_p2 = por %p479_p0, %p478_p13 }
  0x33   : > { %p481_p3 = pnand %p480_p2, %p474_p11 }
  0x35   : > { %484 = shalt.err (!%p481_p3)
}
  0x36   : > { %s538_s25 = smov 384   ;;  %s539_s27 = smov 256  }
  0x37   : > { %132 = dma.hbm_to_vmem [thread:$0]  (%p362_p12), %s619_s2, %s608_s24, %s622_s4, %s611_s26, %s538_s25, %s539_s27, %s364_s3  }
  0x38 PF: > { %p367_p1 = scmp.ge.s32.totalorder %s535_s11, 1  ;;  %p134_p4 = scmp.lt.s32.totalorder %s535_s11, 3 }
  0x3a   : > { %p135_p5 = pnand %p367_p1, %p134_p4 }
  0x3b   : > { %s140_s28 = sand.u32 (!%p135_p5), 1, %s519_s7  }
  0x3c   : > { %138 = sbr.rel (%p135_p5) target bundleno = 320 (0x140), region = 24  ;;  %s368_s29 = sshll.u32 (!%p135_p5), %s140_s28, 6 }
  0x3d   : > { %s141_s30 = scalar_lea.sflag (!%p135_p5), [#allocation3], %s140_s28  ;;  %s654_s5 = scalar_lea.vmem (!%p135_p5), [#allocation2], %s368_s29 }
  0x43   : > { %510 = dma.done.wait (%p593_p8), %s141_s30, 1024  }
  0x44   : > { %512 = vsyncadd (%p593_p8), %s141_s30, 4294966272  ;;  %p369_p12 = scmp.ne.s32.totalorder %s527_s9, 0 }
  0x45   : > { %vm182_vm0 = vcmask (!%p369_p12), 261120   ;;  %v540_v0 = vmov (!%p369_p12), 0.0  }
  0x46   : > { %181 = sbr.rel (%p369_p12) target bundleno = 77 (0x4d), region = 32  ;;  %183 = vst.msk [vmem:[%s745_s1] sm:$0xff] (!%p369_p12), %vm182_vm0, %v540_v0  ;;  %184 = vst.msk [vmem:[%s745_s1 + $0x8] sm:$0xff] (!%p369_p12), %vm182_vm0, %v540_v0 }
  0x47   : > { %185 = vst.msk [vmem:[%s745_s1 + $0x10] sm:$0xff] (!%p369_p12), %vm182_vm0, %v540_v0  ;;  %186 = vst.msk [vmem:[%s745_s1 + $0x18] sm:$0xff] (!%p369_p12), %vm182_vm0, %v540_v0 }
  0x4d PF: > { %s370_s13 = sshll.u32 %s527_s9, 8  ;;  %v198_v1 = vlaneseq  ;;  %v188_v4 = vld [vmem:[%s654_s5 + $0x8] sm:$0xff]  ;;  %v190_v5 = vld [vmem:[%s654_s5 + $0x18] sm:$0xff]  ;;  %v187_v7 = vld [vmem:[%s654_s5] sm:$0xff]  ;;  %vm279_vm5 = vcmask 261120  }
  0x4e   : > { %v201_v2 = vstv %s370_s13  ;;  %v189_v8 = vld [vmem:[%s654_s5 + $0x10] sm:$0xff]  ;;  %v192_v10 = vld [vmem:[%s654_s5 + $0x28] sm:$0xff]  ;;  %v194_v11 = vld [vmem:[%s654_s5 + $0x38] sm:$0xff]  ;;  %v372_v13 = vpack.c.bf16 %v190_v5, %v188_v4 }
  0x4f   : > { %v199_v3 = vand.u32 127, %v198_v1  ;;  %v375_v14 = vpack.c.bf16 %v189_v8, %v187_v7  ;;  %v378_v16 = vpack.c.bf16 %v194_v11, %v192_v10  ;;  %v191_v17 = vld [vmem:[%s654_s5 + $0x20] sm:$0xff]  ;;  %v193_v18 = vld [vmem:[%s654_s5 + $0x30] sm:$0xff]  ;;  %v223_v24 = vld [vmem:[%s745_s1 + $0x8] sm:$0xff] }
  0x50   : > { %v381_v19 = vpack.c.bf16 %v193_v18, %v191_v17  ;;  %v222_v20 = vld [vmem:[%s745_s1] sm:$0xff]  ;;  %v224_v21 = vld [vmem:[%s745_s1 + $0x10] sm:$0xff]  ;;  %v225_v25 = vld [vmem:[%s745_s1 + $0x18] sm:$0xff] }
  0x51   : > { %v200_v6 = vadd.s32 128, %v199_v3  ;;  %v202_v9 = vadd.s32 %v201_v2, %v199_v3 }
  0x53   : > { %v203_v12 = vadd.s32 %v201_v2, %v200_v6  ;;  %vm204_vm1 = vcmp.lt.s32.totalorder %v202_v9, 300 }
  0x54   : > { %vm680_vm3 = vmpackc.low %vm204_vm1, %vm204_vm1 }
  0x55   : > { %vm205_vm2 = vcmp.lt.s32.totalorder %v203_v12, 300 }
  0x56   : > { %vm371_vm4 = vmpackc.low %vm205_vm2, %vm205_vm2 }
  0x57   : > { %373 = vmatprep.subr.msk.bf16.mxu0 %vm371_vm4, %v372_v13  ;;  %401 = vmatprep.subr.msk.bf16.mxu1 %vm371_vm4, %v372_v13 }
  0x58   : > { %376 = vmatpush1.bf16.xpose.msk.msra.mxu0 %vm680_vm3, %v375_v14  ;;  %403 = vmatpush1.bf16.xpose.msk.msra.mxu1 %vm680_vm3, %v375_v14 }
  0x59   : > { %379 = vmatprep.subr.msk.bf16.mxu0 %vm371_vm4, %v378_v16  ;;  %402 = vmatprep.subr.msk.bf16.mxu1 %vm371_vm4, %v378_v16 }
  0x5a   : > { %385 = vmatprep.mubr.msk.bf16.mxu0 %vm371_vm4, %v372_v13  ;;  %391 = vmatprep.mubr.msk.bf16.mxu1 %vm371_vm4, %v378_v16 }
  0x60   : > { %382 = vmatpush1.bf16.xpose.msk.msra.mxu0 %vm680_vm3, %v381_v19  ;;  %404 = vmatpush1.bf16.xpose.msk.msra.mxu1 %vm680_vm3, %v381_v19 }
  0x67   : > { %388 = vmatmul.mubr.msk.bf16.vlgmr.msra.gmra.mrb[0].mxu0 %vm680_vm3, %v375_v14  ;;  %394 = vmatmul.mubr.msk.bf16.vlgmr.msra.gmra.mrb[0].mxu1 %vm680_vm3, %v381_v19 }
 0x13a   : > { %v260_v22 = vpop.f32.mrb[0].mxu0  ;;  %v268_v23 = vpop.f32.mrb[0].mxu1 }
 0x13b   : > { %v275_v26 = vadd.f32 %v260_v22, %v222_v20  ;;  %v277_v27 = vadd.f32 %v268_v23, %v224_v21  ;;  %v262_v28 = vpop.f32.mrb[1].mxu0  ;;  %v270_v29 = vpop.f32.mrb[1].mxu1 }
 0x13c   : > { %v263_v30 = vpop.f32.mrb[2].mxu0  ;;  %v271_v31 = vpop.f32.mrb[2].mxu1 }
 0x13d   : > { %280 = vst.msk [vmem:[%s745_s1] sm:$0xff] %vm279_vm5, %v275_v26  ;;  %282 = vst.msk [vmem:[%s745_s1 + $0x10] sm:$0xff] %vm279_vm5, %v277_v27  ;;  %v276_v32 = vadd.f32 %v263_v30, %v223_v24  ;;  %v278_v33 = vadd.f32 %v271_v31, %v225_v25  ;;  %v265_v34 = vpop.f32.mrb[3].mxu0  ;;  %v273_v35 = vpop.f32.mrb[3].mxu1 }
 0x13f   : > { %281 = vst.msk [vmem:[%s745_s1 + $0x8] sm:$0xff] %vm279_vm5, %v276_v32  ;;  %283 = vst.msk [vmem:[%s745_s1 + $0x18] sm:$0xff] %vm279_vm5, %v278_v33 }
 0x140 PF: > { %s14_s11 = sadd.s32 1, %s535_s11   ;;  %s749_s6 = smov %s519_s7 }
 0x141   : > { %p11_p8 = scmp.ge.s32.totalorder %s14_s11, 4   ;;  %s750_s7 = smov %s523_s8 }
 0x142   : > { %s751_s8 = smov %s600_s19  ;;  %s752_s9 = smov %s531_s10 }
 0x143   : > { %s753_s10 = smov %s755_s12  ;;  %13 = sbr.rel (!%p11_p8) target bundleno = 4 (0x4), region = 68 }
 0x14a   :  { %305 = vsyncpa [#allocation3], 1 }
 0x14b   :  { %307 = vsyncpa [#allocation3 + $0x1], 1 }

// kernel: pcca_em.3
= control target key start
LH: loop header
LB: loop body
LE: loop exit
PB: predicated region body
PF: predicated region fallthrough
CT: control target
= control target key end

     0   :  { %vm2812_vm0 = vcmask 7168   ;;  %v2167_v0 = vmov 0   ;;  %vm368_vm1 = vcmask 31744   ;;  %v2168_v13 = vmov 0.0|0.0   ;;  %s2805_s2 = inlined_call_operand.vmem [shape: f32[32,1], index: 2, kind: input, shape index: {}]   ;;  %s2806_s4 = inlined_call_operand.vmem [shape: f32[32,1], index: 4, kind: output, shape index: {1}]   ;;  %s2807_s1 = inlined_call_operand.vmem [shape: f32[32,4], index: 1, kind: input, shape index: {}]   ;;  %s2808_s3 = inlined_call_operand.vmem [shape: f32[32,4], index: 3, kind: output, shape index: {0}]   ;;  %s2809_s5 = inlined_call_operand.vmem [shape: f32[3,1], index: 5, kind: output, shape index: {2}]   ;;  %s2810_s0 = inlined_call_operand.vmem [shape: f32[32,32], index: 0, kind: input, shape index: {}]  }
   0x1   :  { %2109 = vset.pattern.permute.xlu0 %v2167_v0  ;;  %v61_v1 = vld [vmem:[%s2805_s2] sm:$0xff]  ;;  %v62_v2 = vld [vmem:[%s2805_s2 + $0x8] sm:$0xff]  ;;  %v64_v3 = vld [vmem:[%s2805_s2 + $0x18] sm:$0xff]  ;;  %2110 = vset.pattern.permute.xlu1 %v2167_v0  ;;  %vm2811_vm2 = vcmask 2048   ;;  %vm2169_vm3 = vmmov 0   ;;  %v2170_v14 = vmov 0.0   ;;  %v21_v27 = vlaneseq }
   0x2   :  { %2111 = vrcp.f32 %v61_v1  ;;  %702 = vst.msk [vmem:[%s2806_s4] sm:$0xff] %vm2812_vm0, %v61_v1  ;;  %703 = vst.msk [vmem:[%s2806_s4 + $0x8] sm:$0xff] %vm2812_vm0, %v62_v2  ;;  %v63_v4 = vld [vmem:[%s2805_s2 + $0x10] sm:$0xff]  ;;  %v2231_v5 = vld [vmem:[%s2807_s1] sm:$0xff]  ;;  %2010 = vmatprep.subr.bf16.mxu0 %v2168_v13  ;;  %2016 = vmatprep.subr.bf16.mxu1 %v2168_v13  ;;  %vm44_vm5 = vcmask 261120   ;;  %vm207_vm10 = vcmask 27648  }
   0x3   :  { %705 = vst.msk [vmem:[%s2806_s4 + $0x18] sm:$0xff] %vm2812_vm0, %v64_v3  ;;  %v2236_v6 = vld [vmem:[%s2807_s1 + $0x8] sm:$0xff]  ;;  %704 = vst.msk [vmem:[%s2806_s4 + $0x10] sm:$0xff] %vm2812_vm0, %v63_v4  ;;  %v2255_v7 = vld [vmem:[%s2807_s1 + $0x10] sm:$0xff]  ;;  %2113 = vrcp.f32 %v62_v2  ;;  %1898 = vmatprep.mubr.msk.f32.mxu0 %vm2169_vm3, %v2170_v14  ;;  %1909 = vmatprep.mubr.msk.f32.mxu1 %vm2169_vm3, %v2170_v14  ;;  %v2305_v28 = vshrl.u32 %v21_v27, 7  ;;  %v2307_v29 = vand.u32 127, %v21_v27 }
   0x4   :  { %697 = vst.msk [vmem:[%s2808_s3] sm:$0xff] %vm368_vm1, %v2231_v5  ;;  %698 = vst.msk [vmem:[%s2808_s3 + $0x8] sm:$0xff] %vm368_vm1, %v2236_v6  ;;  %v2260_v8 = vld [vmem:[%s2807_s1 + $0x18] sm:$0xff]  ;;  %2115 = vrcp.f32 %v63_v4 }
   0x5   :  { %699 = vst.msk [vmem:[%s2808_s3 + $0x10] sm:$0xff] %vm368_vm1, %v2255_v7  ;;  %700 = vst.msk [vmem:[%s2808_s3 + $0x18] sm:$0xff] %vm368_vm1, %v2260_v8  ;;  %2117 = vrcp.f32 %v64_v3  ;;  %vm25_vm6 = vcmp.eq.s32.totalorder %v2305_v28, %v2307_v29  ;;  %vm203_vm7 = vcmp.eq.s32.totalorder %v2305_v28, 0  ;;  %vm204_vm8 = vcmp.eq.s32.totalorder %v2307_v29, 0 }
   0x6   :  { %712 = vst.msk [vmem:[%s2809_s5] sm:$0x7] %vm2811_vm2, %v2170_v14  ;;  %vm2291_vm4 = vmpackc.low %vm368_vm1, %vm368_vm1  ;;  %v2314_v30 = vsel %vm25_vm6, 1.0, %v2170_v14  ;;  %vm249_vm11 = vcmp.eq.s32.totalorder %v2307_v29, 1  ;;  %vm248_vm12 = vcmp.eq.s32.totalorder %v2305_v28, 1  ;;  %vm2816_vm14 = vcmp.eq.s32.totalorder %v2305_v28, 2 }
   0x7   :  { %vm2320_vm9 = vmand %vm203_vm7, %vm204_vm8  ;;  %v229_v4 = vsel %vm203_vm7, %v2314_v30, 0.0  ;;  %vm2813_vm15 = vcmp.eq.s32.totalorder %v2307_v29, 2  ;;  %vm2814_vm2 = vcmp.eq.s32.totalorder %v2305_v28, 3  ;;  %vm2815_vm0 = vcmp.eq.s32.totalorder %v2307_v29, 3 }
   0x8   :  { %vm2340_vm13 = vmand %vm248_vm12, %vm249_vm11 }
   0x9   :  { %vm2374_vm6 = vmand %vm2816_vm14, %vm2813_vm15 }
   0xc   :  { %v2112_v9 = vpop.eup %2111 }
   0xd   :  { %75 = vperm.xlu0 %2109, %v2112_v9   ;;  %v2114_v10 = vpop.eup %2113 }
   0xe   :  { %v2116_v11 = vpop.eup %2115 }
   0xf   :  { %85 = vperm.xlu1 %2110, %v2116_v11   ;;  %v2118_v12 = vpop.eup %2117 }
  0x11   :  { %80 = vperm.xlu0 %2109, %v2114_v10   ;;  %v230_v10 = vsel %vm207_vm10, %v229_v4, 0.0 }
  0x13   :  { %90 = vperm.xlu1 %2110, %v2118_v12  }
  0x2f   :  { %97 = vxpose.xlu0.b32.start [1/4] (short) (narrow) %v2231_v5, 8 }
  0x33   :  { %98 = vxpose.xlu0.b32.cont [2/4] (short) (narrow) %v2236_v6, 8 }
  0x37   :  { %99 = vxpose.xlu0.b32.cont [3/4] (short) (narrow) %v2255_v7, 8 }
  0x3b   :  { %100 = vxpose.xlu0.b32.end [4/4] (short) (narrow) %v2260_v8, 8 }
  0x8c   :  { %v76_v15 = vpop.permute.xlu0 %75 }
  0x8d   :  { %v93_v18 = vmul.f32 %v76_v15, %v2231_v5  ;;  %v231_v15 = vrot.slane %v230_v10, 4 }
  0x8e   :  { %v86_v16 = vpop.permute.xlu1 %85 }
  0x8f   :  { %v95_v21 = vmul.f32 %v86_v16, %v2255_v7 }
  0x90   :  { %v81_v17 = vpop.permute.xlu0 %80 }
  0x91   :  { %v94_v19 = vmul.f32 %v81_v17, %v2236_v6 }
  0x92   :  { %v91_v23 = vpop.permute.xlu1 %90 }
  0x93   :  { %v2011_v22 = vpack.c.bf16 %v94_v19, %v93_v18  ;;  %v96_v24 = vmul.f32 %v91_v23, %v2260_v8  ;;  %v232_v18 = vadd.f32 %v231_v15, %v230_v10 }
  0x95   :  { %2012 = vmatpush3.bf16.msra.mxu0 %v2011_v22  ;;  %2019 = vmatpush3.bf16.xpose.msk.msra.mxu1 %vm2291_vm4, %v2011_v22  ;;  %v2014_v25 = vpack.c.bf16 %v96_v24, %v95_v21  ;;  %v233_v19 = vrot.slane %v232_v18, 2 }
  0x96   :  { %2013 = vmatprep.subr.bf16.mxu0 %v2168_v13  ;;  %2020 = vmatprep.subr.bf16.mxu1 %v2168_v13 }
  0x97   :  { %v234_v21 = vadd.f32 %v233_v19, %v232_v18 }
  0x99   :  { %2015 = vmatpush3.bf16.msra.mxu0 %v2014_v25  ;;  %v235_v22 = vrot.slane %v234_v21, 1 }
  0x9b   :  { %v2356_v23 = vadd.f32 %v235_v22, %v234_v21 }
  0x9d   :  { %2023 = vmatpush3.bf16.xpose.msk.msra.mxu1 %vm2291_vm4, %v2014_v25 }
  0x9e   :  { %2030 = vmatprep.subr.bf16.mxu1 %v2168_v13 }
  0xaf   :  { %v113_v26 = vpop.trf.xlu0 }
  0xb0   :  { %1899 = vmatmul.mubr.msk.f32.vlgmr.msra.gmra.mrb[0].mxu0 %vm44_vm5, %v113_v26 }
 0x183   :  { %v198_v31 = vpop.f32.mrb[0].mxu0 }
 0x184   :  { %v202_v33 = vadd.f32 %v2314_v30, %v198_v31  ;;  %v1900_v34 = vpop.f32.mrb[1].mxu0 }
 0x186   :  { %v206_v35 = vsel %vm2320_vm9, %v202_v33, 0.0  ;;  %v238_v37 = vsel %vm204_vm8, %v202_v33, 0.0  ;;  %v218_v46 = vsel %vm203_vm7, %v202_v33, 0.0 }
 0x187   :  { %v208_v36 = vsel %vm207_vm10, %v206_v35, 0.0  ;;  %v239_v38 = vsel %vm207_vm10, %v238_v37, 0.0  ;;  %v219_v47 = vsel %vm207_vm10, %v218_v46, 0.0 }
 0x188   :  { %209 = vadd.xlane.f32.xlu1 %v208_v36  ;;  %v220_v48 = vrot.slane %v219_v47, 4 }
 0x18a   :  { %v221_v49 = vadd.f32 %v220_v48, %v219_v47 }
 0x18c   :  { %240 = vadd.xlane.f32.xlu1 %v239_v38  ;;  %v222_v50 = vrot.slane %v221_v49, 2 }
 0x18e   :  { %v223_v52 = vadd.f32 %v222_v50, %v221_v49 }
 0x190   :  { %v224_v53 = vrot.slane %v223_v52, 1 }
 0x192   :  { %v225_v54 = vadd.f32 %v224_v53, %v223_v52 }
 0x215   :  { %v210_v39 = vpop.xlane.xlu1 %209 }
 0x216   :  { %v211_v40 = vrot.slane %v210_v39, 4 }
 0x218   :  { %v212_v41 = vadd.f32 %v211_v40, %v210_v39 }
 0x219   :  { %v241_v57 = vpop.xlane.xlu1 %240 }
 0x21a   :  { %v213_v42 = vrot.slane %v212_v41, 2 }
 0x21c   :  { %v214_v43 = vadd.f32 %v213_v42, %v212_v41 }
 0x21e   :  { %v215_v44 = vrot.slane %v214_v43, 1 }
 0x220   :  { %v216_v45 = vadd.f32 %v215_v44, %v214_v43 }
 0x222   :  { %2062 = vpush %v216_v45 }
 0x253   :  { %s2063_s25 = spop %2062 }
 0x254   :  { %v226_v51 = vstv %s2063_s25 }
 0x255   :  { %2119 = vrcp.f32 %v226_v51 }
 0x25f   :  { %v2120_v55 = vpop.eup %2119 }
 0x260   :  { %v228_v56 = vmul.f32 %v2120_v55, %v225_v54  ;;  %v237_v24 = vmul.f32 %v2120_v55, %v2356_v23 }
 0x262   :  { %v242_v58 = vmul.f32 %v241_v57, %v228_v56  ;;  %v245_v25 = vmul.f32 %v241_v57, %v237_v24 }
 0x264   :  { %v243_v59 = vsub.f32 %v202_v33, %v242_v58  ;;  %v246_v26 = vsub.f32 %v2314_v30, %v245_v25 }
 0x266   :  { %v244_v61 = vsel %vm203_vm7, %v228_v56, %v243_v59  ;;  %v247_v27 = vsel %vm203_vm7, %v237_v24, %v246_v26 }
 0x267   :  { %v282_v62 = vsel %vm249_vm11, %v244_v61, 0.0  ;;  %v251_v63 = vsel %vm2340_vm13, %v244_v61, 0.0  ;;  %v262_v31 = vsel %vm248_vm12, %v244_v61, 0.0  ;;  %v273_v33 = vsel %vm248_vm12, %v247_v27, 0.0 }
 0x268   :  { %v283_v0 = vsel %vm207_vm10, %v282_v62, 0.0  ;;  %v252_v1 = vsel %vm207_vm10, %v251_v63, 0.0  ;;  %v263_v34 = vsel %vm207_vm10, %v262_v31, 0.0  ;;  %v274_v35 = vsel %vm207_vm10, %v273_v33, 0.0 }
 0x269   :  { %284 = vadd.xlane.f32.xlu0 %v283_v0  ;;  %253 = vadd.xlane.f32.xlu1 %v252_v1  ;;  %v264_v36 = vrot.slane %v263_v34, 4  ;;  %v275_v37 = vrot.slane %v274_v35, 4 }
 0x26b   :  { %v276_v38 = vadd.f32 %v275_v37, %v274_v35  ;;  %v265_v39 = vadd.f32 %v264_v36, %v263_v34 }
 0x26d   :  { %v277_v40 = vrot.slane %v276_v38, 2  ;;  %v266_v41 = vrot.slane %v265_v39, 2 }
 0x26f   :  { %v278_v43 = vadd.f32 %v277_v40, %v276_v38  ;;  %v267_v44 = vadd.f32 %v266_v41, %v265_v39 }
 0x271   :  { %v279_v45 = vrot.slane %v278_v43, 1  ;;  %v268_v46 = vrot.slane %v267_v44, 1 }
 0x273   :  { %v280_v47 = vadd.f32 %v279_v45, %v278_v43  ;;  %v269_v48 = vadd.f32 %v268_v46, %v267_v44 }
 0x2f6   :  { %v254_v2 = vpop.xlane.xlu1 %253  ;;  %v285_v52 = vpop.xlane.xlu0 %284 }
 0x2f7   :  { %v255_v3 = vrot.slane %v254_v2, 4 }
 0x2f9   :  { %v256_v9 = vadd.f32 %v255_v3, %v254_v2 }
 0x2fb   :  { %v257_v11 = vrot.slane %v256_v9, 2 }
 0x2fd   :  { %v258_v12 = vadd.f32 %v257_v11, %v256_v9 }
 0x2ff   :  { %v259_v16 = vrot.slane %v258_v12, 1 }
 0x301   :  { %v260_v17 = vadd.f32 %v259_v16, %v258_v12 }
 0x303   :  { %2064 = vpush %v260_v17 }
 0x334   :  { %s2065_s26 = spop %2064 }
 0x335   :  { %v270_v42 = vstv %s2065_s26 }
 0x336   :  { %2121 = vrcp.f32 %v270_v42 }
 0x340   :  { %v2122_v49 = vpop.eup %2121 }
 0x341   :  { %v281_v50 = vmul.f32 %v2122_v49, %v280_v47  ;;  %v272_v51 = vmul.f32 %v2122_v49, %v269_v48 }
 0x343   :  { %v289_v53 = vmul.f32 %v285_v52, %v281_v50  ;;  %v286_v54 = vmul.f32 %v285_v52, %v272_v51 }
 0x345   :  { %v290_v55 = vsub.f32 %v247_v27, %v289_v53  ;;  %v287_v56 = vsub.f32 %v244_v61, %v286_v54 }
 0x347   :  { %v291_v58 = vsel %vm248_vm12, %v281_v50, %v290_v55  ;;  %v288_v59 = vsel %vm248_vm12, %v272_v51, %v287_v56 }
 0x348   :  { %v295_v62 = vsel %vm2374_vm6, %v288_v59, 0.0  ;;  %v326_v61 = vsel %vm2813_vm15, %v288_v59, 0.0  ;;  %v306_v12 = vsel %vm2816_vm14, %v288_v59, 0.0  ;;  %v317_v15 = vsel %vm2816_vm14, %v291_v58, 0.0  ;;  %vm2400_vm15 = vmand %vm2814_vm2, %vm2815_vm0 }
 0x349   :  { %v296_v63 = vsel %vm207_vm10, %v295_v62, 0.0  ;;  %v327_v0 = vsel %vm207_vm10, %v326_v61, 0.0  ;;  %v307_v16 = vsel %vm207_vm10, %v306_v12, 0.0  ;;  %v318_v17 = vsel %vm207_vm10, %v317_v15, 0.0 }
 0x34a   :  { %297 = vadd.xlane.f32.xlu1 %v296_v63  ;;  %v308_v18 = vrot.slane %v307_v16, 4  ;;  %v319_v19 = vrot.slane %v318_v17, 4 }
 0x34c   :  { %v309_v21 = vadd.f32 %v308_v18, %v307_v16  ;;  %v320_v22 = vadd.f32 %v319_v19, %v318_v17  ;;  %v2425_v18 = vld [vmem:[%s2810_s0] sm:$0xff] }
 0x34d   :  { %1914 = vmatprep.mubr.msk.f32.mxu0 %vm44_vm5, %v2425_v18 }
 0x34e   :  { %328 = vadd.xlane.f32.xlu1 %v327_v0  ;;  %v321_v24 = vrot.slane %v320_v22, 2  ;;  %v310_v25 = vrot.slane %v309_v21, 2 }
 0x350   :  { %v322_v27 = vadd.f32 %v321_v24, %v320_v22  ;;  %v311_v31 = vadd.f32 %v310_v25, %v309_v21  ;;  %v2434_v22 = vld [vmem:[%s2810_s0 + $0x8] sm:$0xff]  ;;  %v2025_v24 = vpack.c.bf16 %v2236_v6, %v2231_v5  ;;  %v2442_v25 = vld [vmem:[%s2810_s0 + $0x10] sm:$0xff]  ;;  %v2028_v5 = vpack.c.bf16 %v2260_v8, %v2255_v7 }
 0x351   :  { %v40_v6 = vmul.f32 %v2314_v30, %v2425_v18  ;;  %v30_v7 = vadd.s32 24, %v2305_v28 }
 0x352   :  { %v323_v33 = vrot.slane %v322_v27, 1  ;;  %v312_v34 = vrot.slane %v311_v31, 1 }
 0x353   :  { %v45_v8 = vsel %vm44_vm5, %v40_v6, 0.0 }
 0x354   :  { %v324_v35 = vadd.f32 %v323_v33, %v322_v27  ;;  %v313_v36 = vadd.f32 %v312_v34, %v311_v31  ;;  %v28_v27 = vadd.s32 8, %v2305_v28  ;;  %v29_v31 = vadd.s32 16, %v2305_v28 }
 0x3d7   :  { %v298_v1 = vpop.xlane.xlu1 %297 }
 0x3d8   :  { %v299_v2 = vrot.slane %v298_v1, 4 }
 0x3da   :  { %v300_v3 = vadd.f32 %v299_v2, %v298_v1 }
 0x3db   :  { %v329_v40 = vpop.xlane.xlu1 %328 }
 0x3dc   :  { %v301_v4 = vrot.slane %v300_v3, 2 }
 0x3de   :  { %v302_v9 = vadd.f32 %v301_v4, %v300_v3 }
 0x3e0   :  { %v303_v10 = vrot.slane %v302_v9, 1 }
 0x3e2   :  { %v304_v11 = vadd.f32 %v303_v10, %v302_v9 }
 0x3e4   :  { %2066 = vpush %v304_v11 }
 0x415   :  { %s2067_s27 = spop %2066 }
 0x416   :  { %v314_v26 = vstv %s2067_s27 }
 0x417   :  { %2123 = vrcp.f32 %v314_v26  ;;  %v2451_v26 = vld [vmem:[%s2810_s0 + $0x18] sm:$0xff]  ;;  %s2495_s0 = smov 0  }
 0x421   :  { %v2124_v37 = vpop.eup %2123 }
 0x422   :  { %v325_v38 = vmul.f32 %v2124_v37, %v324_v35  ;;  %v316_v39 = vmul.f32 %v2124_v37, %v313_v36 }
 0x424   :  { %v333_v41 = vmul.f32 %v329_v40, %v325_v38  ;;  %v330_v42 = vmul.f32 %v329_v40, %v316_v39 }
 0x426   :  { %v331_v43 = vsub.f32 %v288_v59, %v330_v42  ;;  %v334_v44 = vsub.f32 %v291_v58, %v333_v41 }
 0x428   :  { %v332_v46 = vsel %vm2816_vm14, %v316_v39, %v331_v43  ;;  %v335_v47 = vsel %vm2816_vm14, %v325_v38, %v334_v44  ;;  %vm33_vm14 = vcmp.eq.s32.totalorder %v30_v7, %v2307_v29 }
 0x429   :  { %v339_v48 = vsel %vm2400_vm15, %v332_v46, 0.0  ;;  %v361_v50 = vsel %vm2815_vm0, %v332_v46, 0.0  ;;  %v350_v62 = vsel %vm2814_vm2, %v335_v47, 0.0  ;;  %vm32_vm0 = vcmp.eq.s32.totalorder %v29_v31, %v2307_v29 }
 0x42a   :  { %v340_v49 = vsel %vm207_vm10, %v339_v48, 0.0  ;;  %v362_v51 = vsel %vm207_vm10, %v361_v50, 0.0  ;;  %v351_v63 = vsel %vm207_vm10, %v350_v62, 0.0  ;;  %v1792_v34 = vsel %vm32_vm0, 1.0, %v2170_v14 }
 0x42b   :  { %341 = vadd.xlane.f32.xlu1 %v340_v49  ;;  %v352_v61 = vrot.slane %v351_v63, 4  ;;  %v42_v36 = vmul.f32 %v1792_v34, %v2442_v25  ;;  %v1793_v37 = vsel %vm33_vm14, 1.0, %v2170_v14 }
 0x42c   :  { %v43_v40 = vmul.f32 %v1793_v37, %v2451_v26 }
 0x42d   :  { %v353_v0 = vadd.f32 %v352_v61, %v351_v63  ;;  %v51_v39 = vsel %vm44_vm5, %v42_v36, 0.0 }
 0x42e   :  { %v54_v41 = vsel %vm44_vm5, %v43_v40, 0.0 }
 0x42f   :  { %363 = vadd.xlane.f32.xlu1 %v362_v51  ;;  %v354_v1 = vrot.slane %v353_v0, 2 }
 0x431   :  { %v355_v3 = vadd.f32 %v354_v1, %v353_v0 }
 0x433   :  { %v356_v4 = vrot.slane %v355_v3, 1  ;;  %46 = vadd.xlane.f32.xlu1 %v45_v8 }
 0x435   :  { %v357_v9 = vadd.f32 %v356_v4, %v355_v3 }
 0x4b8   :  { %v342_v52 = vpop.xlane.xlu1 %341 }
 0x4b9   :  { %v343_v53 = vrot.slane %v342_v52, 4 }
 0x4bb   :  { %v344_v54 = vadd.f32 %v343_v53, %v342_v52 }
 0x4bc   :  { %v364_v12 = vpop.xlane.xlu1 %363 }
 0x4bd   :  { %v345_v55 = vrot.slane %v344_v54, 2 }
 0x4bf   :  { %v346_v56 = vadd.f32 %v345_v55, %v344_v54 }
 0x4c0   :  { %v2485_v50 = vpop.xlane.xlu1 %46 }
 0x4c1   :  { %v347_v58 = vrot.slane %v346_v56, 1 }
 0x4c3   :  { %v348_v59 = vadd.f32 %v347_v58, %v346_v56 }
 0x4c5   :  { %2068 = vpush %v348_v59 }
 0x4f6   :  { %s2069_s28 = spop %2068 }
 0x4f7   :  { %v358_v2 = vstv %s2069_s28 }
 0x4f8   :  { %2125 = vrcp.f32 %v358_v2 }
 0x502   :  { %v2126_v10 = vpop.eup %2125 }
 0x503   :  { %v360_v11 = vmul.f32 %v2126_v10, %v357_v9 }
 0x505   :  { %v365_v15 = vmul.f32 %v364_v12, %v360_v11 }
 0x507   :  { %v366_v16 = vsub.f32 %v335_v47, %v365_v15 }
 0x509   :  { %v367_v17 = vsel %vm2814_vm2, %v360_v11, %v366_v16  ;;  %vm31_vm2 = vcmp.eq.s32.totalorder %v28_v27, %v2307_v29 }
 0x50a   :  { %1910 = vmatmul.mubr.msk.f32.vlgmr.msra.gmra.mrb[0].mxu1 %vm368_vm1, %v367_v17  ;;  %v1791_v33 = vsel %vm31_vm2, 1.0, %v2170_v14 }
 0x50b   :  { %1939 = vmatprep.mubr.msk.f32.mxu1 %vm2169_vm3, %v2170_v14  ;;  %v41_v35 = vmul.f32 %v1791_v33, %v2434_v22 }
 0x50d   :  { %v48_v38 = vsel %vm44_vm5, %v41_v35, 0.0 }
 0x50e   :  { %49 = vadd.xlane.f32.xlu1 %v48_v38 }
 0x512   :  { %52 = vadd.xlane.f32.xlu1 %v51_v39 }
 0x516   :  { %55 = vadd.xlane.f32.xlu1 %v54_v41 }
 0x59b   :  { %v2487_v51 = vpop.xlane.xlu1 %49 }
 0x59f   :  { %v2489_v52 = vpop.xlane.xlu1 %52 }
 0x5a3   :  { %v2491_v53 = vpop.xlane.xlu1 %55 }
 0x5dd   :  { %v450_v19 = vpop.f32.mrb[0].mxu1 }
 0x5de   :  { %v1911_v21 = vpop.f32.mrb[1].mxu1  ;;  %1912 = vmatprep.subr.msk.mxu0 %vm44_vm5, %v450_v19 }
 0x5df   :  { %1913 = vmatpush3.xpose.msk.msra.mxu0 %vm44_vm5, %v450_v19 }
 0x5e0   :  { %2024 = vmatprep.subr.bf16.mxu0 %v2168_v13 }
 0x5e2   :  { %1915 = vmatmul.mubr.msk.f32.vlgmr.msra.gmra.mrb[2].mxu0 %vm44_vm5, %v2434_v22 }
 0x5e3   :  { %2026 = vmatpush3.bf16.msra.mxu0 %v2025_v24  ;;  %1917 = vmatprep.mubr.msk.f32.mxu0 %vm44_vm5, %v2442_v25 }
 0x5e4   :  { %2027 = vmatprep.subr.bf16.mxu0 %v2168_v13 }
 0x5e6   :  { %1918 = vmatmul.mubr.msk.f32.gmra.mrb[4].mxu0 %vm44_vm5, %v2451_v26 }
 0x5e7   :  { %2029 = vmatpush3.bf16.msra.mxu0 %v2028_v5  ;;  %1928 = vmatprep.mubr.msk.f32.mxu0 %vm2169_vm3, %v2170_v14 }
 0x5ea   :  { %1929 = vmatmul.mubr.msk.f32.vlgmr.msra.gmra.mrb[6].mxu0 %vm44_vm5, %v450_v19 }
 0x6b5   :  { %v1916_v42 = vpop.f32.mrb[2].mxu0 }
 0x6b6   :  { %707 = vst.msk [vmem:[#allocation2 + $0x8] sm:$0xff] %vm368_vm1, %v1916_v42  ;;  %v535_v43 = vpop.f32.mrb[3].mxu0 }
 0x6b7   :  { %v2031_v44 = vpack.c.bf16 %v1916_v42, %v535_v43  ;;  %706 = vst.msk [vmem:[#allocation2] sm:$0xff] %vm368_vm1, %v535_v43 }
 0x6b9   :  { %v1919_v46 = vpop.f32.mrb[4].mxu0  ;;  %2032 = vmatpush3.bf16.msra.mxu1 %v2031_v44 }
 0x6ba   :  { %709 = vst.msk [vmem:[#allocation2 + $0x18] sm:$0xff] %vm368_vm1, %v1919_v46  ;;  %v545_v14 = vpop.f32.mrb[5].mxu0  ;;  %2033 = vmatprep.subr.bf16.mxu1 %v2168_v13 }
 0x6bb   :  { %v2034_v47 = vpack.c.bf16 %v1919_v46, %v545_v14  ;;  %708 = vst.msk [vmem:[#allocation2 + $0x10] sm:$0xff] %vm368_vm1, %v545_v14 }
 0x6bd   :  { %v620_v48 = vpop.f32.mrb[6].mxu0  ;;  %2035 = vmatpush3.bf16.msra.mxu1 %v2034_v47 }
 0x6be   :  { %v1930_v49 = vpop.f32.mrb[7].mxu0  ;;  %v694_v54 = vsub.f32 %v2314_v30, %v620_v48 }
 0x6c0   :  { %1940 = vmatmul.mubr.msk.f32.vlgmr.msra.gmra.mrb[2].mxu1 %vm44_vm5, %v450_v19  ;;  %v695_v55 = vmul.f32 300.0, %v694_v54 }
 0x793   :  { %v690_v13 = vpop.f32.mrb[2].mxu1 }
 0x794   :  { %v696_v56 = vadd.f32 %v695_v55, %v690_v13  ;;  %v1941_v58 = vpop.f32.mrb[3].mxu1 }
 0x796   :  { %710 = vst.msk [vmem:[#allocation3] sm:$0xf] %vm207_vm10, %v696_v56 }
 0x797 LB: > { %vm2830_vm0 = vcmp.eq.s32.totalorder %v2307_v29, 2  ;;  %vm2831_vm2 = vcmp.eq.s32.totalorder %v2305_v28, 2  ;;  %s2165_s0 = sphi %s2495_s0, %s718_s0  }
 0x798   : > { %vm2832_vm3 = vmmov %vm2831_vm2 }
 0x799   : > { %vm2833_vm14 = vmmov %vm2831_vm2 }
 0x79d   : > { %v723_v59 = vld [vmem:[#allocation3] sm:$0xf] }
 0x79e   : > { %v724_v62 = vsel %vm2320_vm9, %v723_v59, 0.0  ;;  %v747_v63 = vsel %vm204_vm8, %v723_v59, 0.0  ;;  %v735_v12 = vsel %vm203_vm7, %v723_v59, 0.0 }
 0x79f   : > { %v725_v61 = vsel %vm207_vm10, %v724_v62, 0.0  ;;  %v748_v0 = vsel %vm207_vm10, %v747_v63, 0.0  ;;  %v736_v15 = vsel %vm207_vm10, %v735_v12, 0.0 }
 0x7a0   : > { %726 = vadd.xlane.f32.xlu0 %v725_v61  ;;  %v737_v16 = vrot.slane %v736_v15, 4 }
 0x7a2   : > { %v738_v17 = vadd.f32 %v737_v16, %v736_v15 }
 0x7a4   : > { %749 = vadd.xlane.f32.xlu0 %v748_v0  ;;  %v739_v19 = vrot.slane %v738_v17, 2 }
 0x7a6   : > { %v740_v24 = vadd.f32 %v739_v19, %v738_v17 }
 0x7a8   : > { %v741_v5 = vrot.slane %v740_v24, 1 }
 0x7aa   : > { %v742_v6 = vadd.f32 %v741_v5, %v740_v24 }
 0x82d   : > { %v727_v1 = vpop.xlane.xlu0 %726 }
 0x82e   : > { %v728_v2 = vrot.slane %v727_v1, 4 }
 0x830   : > { %v729_v3 = vadd.f32 %v728_v2, %v727_v1 }
 0x831   : > { %v750_v31 = vpop.xlane.xlu0 %749 }
 0x832   : > { %v730_v4 = vrot.slane %v729_v3, 2 }
 0x834   : > { %v731_v9 = vadd.f32 %v730_v4, %v729_v3 }
 0x836   : > { %v732_v10 = vrot.slane %v731_v9, 1 }
 0x838   : > { %v733_v11 = vadd.f32 %v732_v10, %v731_v9 }
 0x83a   : > { %2070 = vpush %v733_v11 }
 0x86b   : > { %s2071_s12 = spop %2070 }
 0x86c   : > { %v743_v21 = vstv %s2071_s12 }
 0x86d   : > { %2127 = vrcp.f32 %v743_v21 }
 0x877   : > { %v2128_v27 = vpop.eup %2127 }
 0x878   : > { %v745_v7 = vmul.f32 %v2128_v27, %v742_v6  ;;  %v746_v14 = vmul.f32 %v2128_v27, %v2356_v23 }
 0x87a   : > { %v751_v8 = vmul.f32 %v750_v31, %v745_v7  ;;  %v754_v47 = vmul.f32 %v750_v31, %v746_v14 }
 0x87c   : > { %v752_v33 = vsub.f32 %v723_v59, %v751_v8  ;;  %v755_v48 = vsub.f32 %v2314_v30, %v754_v47 }
 0x87e   : > { %v753_v34 = vsel %vm203_vm7, %v745_v7, %v752_v33  ;;  %v756_v49 = vsel %vm203_vm7, %v746_v14, %v755_v48 }
 0x87f   : > { %v757_v35 = vsel %vm2340_vm13, %v753_v34, 0.0  ;;  %v788_v37 = vsel %vm249_vm11, %v753_v34, 0.0  ;;  %v779_v54 = vsel %vm248_vm12, %v756_v49, 0.0  ;;  %v768_v55 = vsel %vm248_vm12, %v753_v34, 0.0 }
 0x880   : > { %v758_v36 = vsel %vm207_vm10, %v757_v35, 0.0  ;;  %v789_v38 = vsel %vm207_vm10, %v788_v37, 0.0  ;;  %v780_v13 = vsel %vm207_vm10, %v779_v54, 0.0  ;;  %v769_v56 = vsel %vm207_vm10, %v768_v55, 0.0 }
 0x881   : > { %759 = vadd.xlane.f32.xlu1 %v758_v36  ;;  %v781_v58 = vrot.slane %v780_v13, 4  ;;  %v770_v59 = vrot.slane %v769_v56, 4 }
 0x883   : > { %v782_v62 = vadd.f32 %v781_v58, %v780_v13  ;;  %v771_v63 = vadd.f32 %v770_v59, %v769_v56 }
 0x885   : > { %790 = vadd.xlane.f32.xlu1 %v789_v38  ;;  %v783_v61 = vrot.slane %v782_v62, 2  ;;  %v772_v0 = vrot.slane %v771_v63, 2 }
 0x887   : > { %v784_v2 = vadd.f32 %v783_v61, %v782_v62  ;;  %v773_v3 = vadd.f32 %v772_v0, %v771_v63 }
 0x889   : > { %v785_v4 = vrot.slane %v784_v2, 1  ;;  %v774_v9 = vrot.slane %v773_v3, 1 }
 0x88b   : > { %v775_v10 = vadd.f32 %v774_v9, %v773_v3  ;;  %v786_v11 = vadd.f32 %v785_v4, %v784_v2 }
 0x90e   : > { %v760_v39 = vpop.xlane.xlu1 %759 }
 0x90f   : > { %v761_v40 = vrot.slane %v760_v39, 4 }
 0x911   : > { %v762_v41 = vadd.f32 %v761_v40, %v760_v39 }
 0x912   : > { %v791_v17 = vpop.xlane.xlu1 %790 }
 0x913   : > { %v763_v42 = vrot.slane %v762_v41, 2 }
 0x915   : > { %v764_v43 = vadd.f32 %v763_v42, %v762_v41 }
 0x917   : > { %v765_v44 = vrot.slane %v764_v43, 1 }
 0x919   : > { %v766_v46 = vadd.f32 %v765_v44, %v764_v43 }
 0x91b   : > { %2072 = vpush %v766_v46 }
 0x94c   : > { %s2073_s13 = spop %2072 }
 0x94d   : > { %v776_v1 = vstv %s2073_s13 }
 0x94e   : > { %2129 = vrcp.f32 %v776_v1 }
 0x958   : > { %v2130_v12 = vpop.eup %2129 }
 0x959   : > { %v778_v15 = vmul.f32 %v2130_v12, %v775_v10  ;;  %v787_v16 = vmul.f32 %v2130_v12, %v786_v11 }
 0x95b   : > { %v792_v19 = vmul.f32 %v791_v17, %v778_v15  ;;  %v795_v21 = vmul.f32 %v791_v17, %v787_v16 }
 0x95d   : > { %v793_v24 = vsub.f32 %v753_v34, %v792_v19  ;;  %v796_v5 = vsub.f32 %v756_v49, %v795_v21  ;;  %v719_v21 = vld [vmem:[#allocation2] sm:$0xff] }
 0x95e   : > { %1944 = vmatprep.mubr.msk.f32.mxu0 %vm368_vm1, %v719_v21 }
 0x95f   : > { %v794_v6 = vsel %vm248_vm12, %v778_v15, %v793_v24  ;;  %v797_v27 = vsel %vm248_vm12, %v787_v16, %v796_v5 }
 0x960   : > { %v829_v31 = vsel %vm2830_vm0, %v794_v6, 0.0  ;;  %v798_v7 = vsel %vm2374_vm6, %v794_v6, 0.0  ;;  %v809_v41 = vsel %vm2831_vm2, %v794_v6, 0.0  ;;  %v820_v42 = vsel %vm2832_vm3, %v797_v27, 0.0  ;;  %vm2834_vm0 = vmmov %vm2831_vm2 }
 0x961   : > { %v830_v8 = vsel %vm207_vm10, %v829_v31, 0.0  ;;  %v799_v33 = vsel %vm207_vm10, %v798_v7, 0.0  ;;  %v810_v43 = vsel %vm207_vm10, %v809_v41, 0.0  ;;  %v821_v44 = vsel %vm207_vm10, %v820_v42, 0.0 }
 0x962   : > { %831 = vadd.xlane.f32.xlu1 %v830_v8  ;;  %800 = vadd.xlane.f32.xlu0 %v799_v33  ;;  %v811_v46 = vrot.slane %v810_v43, 4  ;;  %v822_v14 = vrot.slane %v821_v44, 4  ;;  %vm2835_vm2 = vcmp.eq.s32.totalorder %v2307_v29, 3  ;;  %vm2836_vm3 = vcmp.eq.s32.totalorder %v2305_v28, 3 }
 0x964   : > { %v812_v47 = vadd.f32 %v811_v46, %v810_v43  ;;  %v823_v48 = vadd.f32 %v822_v14, %v821_v44 }
 0x966   : > { %v813_v49 = vrot.slane %v812_v47, 2  ;;  %v824_v54 = vrot.slane %v823_v48, 2 }
 0x968   : > { %v814_v13 = vadd.f32 %v813_v49, %v812_v47  ;;  %v825_v56 = vadd.f32 %v824_v54, %v823_v48  ;;  %v720_v48 = vld [vmem:[#allocation2 + $0x8] sm:$0xff]  ;;  %v721_v49 = vld [vmem:[#allocation2 + $0x10] sm:$0xff]  ;;  %v722_v54 = vld [vmem:[#allocation2 + $0x18] sm:$0xff] }
 0x96a   : > { %v815_v58 = vrot.slane %v814_v13, 1  ;;  %v826_v59 = vrot.slane %v825_v56, 1 }
 0x96c   : > { %v816_v62 = vadd.f32 %v815_v58, %v814_v13  ;;  %v827_v63 = vadd.f32 %v826_v59, %v825_v56 }
 0x9ef   : > { %v801_v34 = vpop.xlane.xlu0 %800  ;;  %v832_v2 = vpop.xlane.xlu1 %831 }
 0x9f0   : > { %v802_v35 = vrot.slane %v801_v34, 4 }
 0x9f2   : > { %v803_v36 = vadd.f32 %v802_v35, %v801_v34 }
 0x9f4   : > { %v804_v37 = vrot.slane %v803_v36, 2 }
 0x9f6   : > { %v805_v38 = vadd.f32 %v804_v37, %v803_v36 }
 0x9f8   : > { %v806_v39 = vrot.slane %v805_v38, 1 }
 0x9fa   : > { %v807_v40 = vadd.f32 %v806_v39, %v805_v38 }
 0x9fc   : > { %2074 = vpush %v807_v40 }
 0xa2d   : > { %s2075_s2 = spop %2074 }
 0xa2e   : > { %v817_v55 = vstv %s2075_s2 }
 0xa2f   : > { %2131 = vrcp.f32 %v817_v55 }
 0xa39   : > { %v2132_v61 = vpop.eup %2131 }
 0xa3a   : > { %v819_v0 = vmul.f32 %v2132_v61, %v816_v62  ;;  %v828_v1 = vmul.f32 %v2132_v61, %v827_v63 }
 0xa3c   : > { %v833_v3 = vmul.f32 %v832_v2, %v819_v0  ;;  %v836_v4 = vmul.f32 %v832_v2, %v828_v1 }
 0xa3e   : > { %v834_v9 = vsub.f32 %v794_v6, %v833_v3  ;;  %v837_v10 = vsub.f32 %v797_v27, %v836_v4 }
 0xa40   : > { %v835_v11 = vsel %vm2833_vm14, %v819_v0, %v834_v9  ;;  %v838_v12 = vsel %vm2834_vm0, %v828_v1, %v837_v10  ;;  %vm2817_vm14 = vcmask 1043456   ;;  %vm2837_vm0 = vmmov %vm2836_vm3  ;;  %v2171_v10 = vmov 0.0|0.0  }
 0xa41   : > { %v861_v15 = vsel %vm2835_vm2, %v835_v11, 0.0  ;;  %v839_v16 = vsel %vm2400_vm15, %v835_v11, 0.0  ;;  %v850_v33 = vsel %vm2836_vm3, %v838_v12, 0.0  ;;  %2036 = vmatprep.subr.bf16.mxu1 %v2171_v10  ;;  %vm2818_vm2 = vmmov 0  }
 0xa42   : > { %v862_v17 = vsel %vm207_vm10, %v861_v15, 0.0  ;;  %v840_v19 = vsel %vm207_vm10, %v839_v16, 0.0  ;;  %v851_v34 = vsel %vm207_vm10, %v850_v33, 0.0  ;;  %v2173_v11 = vmov 0.0  }
 0xa43   : > { %863 = vadd.xlane.f32.xlu1 %v862_v17  ;;  %841 = vadd.xlane.f32.xlu0 %v840_v19  ;;  %v852_v35 = vrot.slane %v851_v34, 4  ;;  %vm2838_vm3 = vcmask 7168  }
 0xa44   : > { %1958 = vmatprep.mubr.msk.f32.mxu1 %vm2818_vm2, %v2173_v11 }
 0xa45   : > { %v853_v36 = vadd.f32 %v852_v35, %v851_v34 }
 0xa47   : > { %v854_v37 = vrot.slane %v853_v36, 2 }
 0xa49   : > { %v855_v39 = vadd.f32 %v854_v37, %v853_v36 }
 0xa4b   : > { %v856_v40 = vrot.slane %v855_v39, 1 }
 0xa4d   : > { %v857_v41 = vadd.f32 %v856_v40, %v855_v39 }
 0xad0   : > { %v842_v24 = vpop.xlane.xlu0 %841  ;;  %v864_v44 = vpop.xlane.xlu1 %863 }
 0xad1   : > { %v843_v5 = vrot.slane %v842_v24, 4 }
 0xad3   : > { %v844_v6 = vadd.f32 %v843_v5, %v842_v24 }
 0xad5   : > { %v845_v27 = vrot.slane %v844_v6, 2 }
 0xad7   : > { %v846_v31 = vadd.f32 %v845_v27, %v844_v6 }
 0xad9   : > { %v847_v7 = vrot.slane %v846_v31, 1 }
 0xadb   : > { %v848_v8 = vadd.f32 %v847_v7, %v846_v31 }
 0xadd   : > { %2076 = vpush %v848_v8 }
 0xb0e   : > { %s2077_s14 = spop %2076 }
 0xb0f   : > { %v858_v38 = vstv %s2077_s14 }
 0xb10   : > { %2133 = vrcp.f32 %v858_v38 }
 0xb1a   : > { %v2134_v42 = vpop.eup %2133 }
 0xb1b   : > { %v860_v43 = vmul.f32 %v2134_v42, %v857_v41 }
 0xb1d   : > { %v865_v46 = vmul.f32 %v864_v44, %v860_v43 }
 0xb1f   : > { %v866_v14 = vsub.f32 %v838_v12, %v865_v46 }
 0xb21   : > { %v867_v47 = vsel %vm2837_vm0, %v860_v43, %v866_v14  ;;  %vm2839_vm0 = vmmov %vm2838_vm3 }
 0xb22   : > { %1942 = vmatprep.subr.msk.mxu0 %vm2817_vm14, %v867_v47 }
 0xb23   : > { %1943 = vmatpush3.msk.msra.mxu0 %vm2817_vm14, %v867_v47  ;;  %vm2840_vm14 = vmmov %vm2839_vm0 }
 0xb24   : > { %1945 = vmatmul.mubr.msk.f32.vlgmr.msra.gmra.mrb[0].mxu0 %vm368_vm1, %v720_v48  ;;  %2042 = vmatprep.subr.bf16.mxu0 %v2171_v10 }
 0xb25   : > { %1947 = vmatprep.mubr.msk.f32.mxu0 %vm368_vm1, %v721_v49 }
 0xb28   : > { %1948 = vmatmul.mubr.msk.f32.gmra.mrb[2].mxu0 %vm368_vm1, %v722_v54 }
 0xb29   : > { %1969 = vmatprep.mubr.msk.f32.mxu0 %vm2818_vm2, %v2173_v11  ;;  %vm2844_vm2 = vmmov %vm2839_vm0 }
 0xbf7   : > { %v2564_v55 = vpop.f32.mrb[0].mxu0 }
 0xbf8   : > { %1756 = vst.msk [vmem:[%s2808_s3 + $0x8] sm:$0xff] %vm368_vm1, %v2564_v55  ;;  %v2571_v13 = vpop.f32.mrb[1].mxu0  ;;  %v970_v56 = vmul.f32 %v2564_v55, %v720_v48 }
 0xbf9   : > { %1755 = vst.msk [vmem:[%s2808_s3] sm:$0xff] %vm368_vm1, %v2571_v13  ;;  %v969_v58 = vmul.f32 %v2571_v13, %v719_v21  ;;  %v2051_v59 = vpack.c.bf16 %v2564_v55, %v2571_v13 }
 0xbfa   : > { %v976_v62 = vsel %vm368_vm1, %v970_v56, 0.0 }
 0xbfb   : > { %977 = vadd.xlane.f32.xlu1 %v976_v62  ;;  %v2583_v63 = vpop.f32.mrb[2].mxu0  ;;  %v973_v61 = vsel %vm368_vm1, %v969_v58, 0.0 }
 0xbfc   : > { %1758 = vst.msk [vmem:[%s2808_s3 + $0x18] sm:$0xff] %vm368_vm1, %v2583_v63  ;;  %974 = vadd.xlane.f32.xlu0 %v973_v61  ;;  %v2591_v0 = vpop.f32.mrb[3].mxu0  ;;  %v972_v1 = vmul.f32 %v2583_v63, %v722_v54 }
 0xbfd   : > { %1757 = vst.msk [vmem:[%s2808_s3 + $0x10] sm:$0xff] %vm368_vm1, %v2591_v0  ;;  %v971_v2 = vmul.f32 %v2591_v0, %v721_v49  ;;  %v2054_v3 = vpack.c.bf16 %v2583_v63, %v2591_v0 }
 0xbfe   : > { %v982_v4 = vsel %vm368_vm1, %v972_v1, 0.0 }
 0xbff   : > { %983 = vadd.xlane.f32.xlu1 %v982_v4  ;;  %v979_v9 = vsel %vm368_vm1, %v971_v2, 0.0 }
 0xc00   : > { %980 = vadd.xlane.f32.xlu0 %v979_v9 }
 0xc2d   : > { %1006 = vxpose.xlu0.b32.start [1/4] (short) (narrow) %v2571_v13, 8 }
 0xc31   : > { %1007 = vxpose.xlu0.b32.cont [2/4] (short) (narrow) %v2564_v55, 8 }
 0xc35   : > { %1008 = vxpose.xlu0.b32.cont [3/4] (short) (narrow) %v2591_v0, 8 }
 0xc39   : > { %1009 = vxpose.xlu0.b32.end [4/4] (short) (narrow) %v2583_v63, 8 }
 0xc88   : > { %v978_v12 = vpop.xlane.xlu1 %977 }
 0xc89   : > { %v986_v15 = vsub.f32 %v2487_v51, %v978_v12  ;;  %v975_v16 = vpop.xlane.xlu0 %974 }
 0xc8a   : > { %v985_v17 = vsub.f32 %v2485_v50, %v975_v16 }
 0xc8b   : > { %v991_v19 = vmul.f32 0.0033333334, %v986_v15 }
 0xc8c   : > { %v990_v21 = vmul.f32 0.0033333334, %v985_v17  ;;  %v984_v24 = vpop.xlane.xlu1 %983 }
 0xc8d   : > { %2135 = vrcp.f32 %v991_v19  ;;  %1760 = vst.msk [vmem:[%s2806_s4 + $0x8] sm:$0xff] %vm2838_vm3, %v991_v19  ;;  %v988_v5 = vsub.f32 %v2491_v53, %v984_v24  ;;  %v981_v6 = vpop.xlane.xlu0 %980  ;;  %vm2841_vm3 = vmmov %vm2839_vm0 }
 0xc8e   : > { %2137 = vlog2.f32 %v991_v19  ;;  %1759 = vst.msk [vmem:[%s2806_s4] sm:$0xff] %vm2839_vm0, %v990_v21  ;;  %v987_v27 = vsub.f32 %v2489_v52, %v981_v6 }
 0xc8f   : > { %2139 = vrcp.f32 %v990_v21  ;;  %v993_v31 = vmul.f32 0.0033333334, %v988_v5 }
 0xc90   : > { %2141 = vlog2.f32 %v990_v21  ;;  %v992_v7 = vmul.f32 0.0033333334, %v987_v27 }
 0xc91   : > { %2143 = vrcp.f32 %v993_v31  ;;  %1762 = vst.msk [vmem:[%s2806_s4 + $0x18] sm:$0xff] %vm2840_vm14, %v993_v31  ;;  %vm2842_vm14 = vmmov %vm2839_vm0 }
 0xc92   : > { %2145 = vlog2.f32 %v993_v31  ;;  %1761 = vst.msk [vmem:[%s2806_s4 + $0x10] sm:$0xff] %vm2841_vm3, %v992_v7  ;;  %vm2843_vm3 = vmmov %vm2839_vm0 }
 0xc93   : > { %2147 = vrcp.f32 %v992_v7 }
 0xc94   : > { %2149 = vlog2.f32 %v992_v7 }
 0xc97   : > { %v2136_v8 = vpop.eup %2135 }
 0xc98   : > { %v2138_v33 = vpop.eup %2137  ;;  %v2635_v34 = vmul.f32 %v2136_v8, %v2564_v55  ;;  %v1573_v35 = vmul.f32 %v2136_v8, %v2487_v51 }
 0xc99   : > { %v2140_v36 = vpop.eup %2139  ;;  %v1728_v37 = vmul.f32 0.6931472, %v2138_v33 }
 0xc9a   : > { %v2142_v38 = vpop.eup %2141  ;;  %v2639_v39 = vmul.f32 %v2140_v36, %v2571_v13  ;;  %v1572_v40 = vmul.f32 %v2140_v36, %v2485_v50  ;;  %v1577_v41 = vsel %vm2842_vm14, %v1573_v35, 0.0  ;;  %vm2846_vm14 = vmmov %vm2839_vm0 }
 0xc9b   : > { %v2144_v42 = vpop.eup %2143  ;;  %v1726_v43 = vmul.f32 0.6931472, %v2142_v38  ;;  %v1734_v44 = vsel %vm2839_vm0, %v1728_v37, 0.0 }
 0xc9c   : > { %v2146_v46 = vpop.eup %2145  ;;  %v2037_v14 = vpack.c.bf16 %v2635_v34, %v2639_v39  ;;  %v2647_v47 = vmul.f32 %v2144_v42, %v2583_v63  ;;  %v1576_v48 = vsel %vm2843_vm3, %v1572_v40, 0.0  ;;  %v1575_v54 = vmul.f32 %v2144_v42, %v2491_v53  ;;  %vm2847_vm3 = vmmov %vm2839_vm0 }
 0xc9d   : > { %v2148_v49 = vpop.eup %2147  ;;  %v1578_v56 = vadd.f32 %v1577_v41, %v1576_v48  ;;  %v1733_v58 = vsel %vm2844_vm2, %v1726_v43, 0.0  ;;  %v1732_v9 = vmul.f32 0.6931472, %v2146_v46  ;;  %vm2845_vm2 = vmmov %vm2839_vm0 }
 0xc9e   : > { %v2150_v62 = vpop.eup %2149  ;;  %2038 = vmatpush3.bf16.msra.mxu1 %v2037_v14  ;;  %2045 = vmatpush3.bf16.xpose.msk.msra.mxu0 %vm2291_vm4, %v2037_v14  ;;  %v2655_v61 = vmul.f32 %v2148_v49, %v2591_v0  ;;  %v1574_v1 = vmul.f32 %v2148_v49, %v2489_v52  ;;  %v1735_v2 = vadd.f32 %v1734_v44, %v1733_v58  ;;  %v1581_v19 = vsel %vm2839_vm0, %v1575_v54, 0.0 }
 0xc9f   : > { %2039 = vmatprep.subr.bf16.mxu1 %v2171_v10  ;;  %2046 = vmatprep.subr.bf16.mxu0 %v2171_v10  ;;  %v1730_v4 = vmul.f32 0.6931472, %v2150_v62  ;;  %v1738_v5 = vsel %vm2847_vm3, %v1732_v9, 0.0 }
 0xca0   : > { %v2040_v12 = vpack.c.bf16 %v2647_v47, %v2655_v61  ;;  %v1579_v15 = vsel %vm2845_vm2, %v1574_v1, 0.0  ;;  %vm2848_vm2 = vcmp.eq.s32.totalorder %v2307_v29, 2 }
 0xca1   : > { %v1580_v16 = vadd.f32 %v1579_v15, %v1578_v56  ;;  %v1736_v17 = vsel %vm2846_vm14, %v1730_v4, 0.0  ;;  %vm2849_vm14 = vcmp.eq.s32.totalorder %v2305_v28, 2 }
 0xca2   : > { %2041 = vmatpush3.bf16.msra.mxu1 %v2040_v12  ;;  %v1737_v21 = vadd.f32 %v1736_v17, %v1735_v2  ;;  %vm2850_vm0 = vmmov %vm2849_vm14 }
 0xca3   : > { %v2665_v24 = vadd.f32 %v1581_v19, %v1580_v16  ;;  %vm2851_vm3 = vmmov %vm2850_vm0 }
 0xca4   : > { %v2668_v6 = vadd.f32 %v1738_v5, %v1737_v21 }
 0xca6   : > { %2049 = vmatpush3.bf16.xpose.msk.msra.mxu0 %vm2291_vm4, %v2040_v12 }
 0xca7   : > { %2056 = vmatprep.subr.bf16.mxu0 %v2171_v10 }
 0xcad   : > { %v1022_v27 = vpop.trf.xlu0 }
 0xcae   : > { %1959 = vmatmul.mubr.msk.f32.vlgmr.msra.gmra.mrb[0].mxu1 %vm44_vm5, %v1022_v27 }
 0xcaf   : > { %1974 = vmatprep.mubr.msk.f32.mxu1 %vm44_vm5, %v2425_v18 }
 0xd81   : > { %v1107_v31 = vpop.f32.mrb[0].mxu1 }
 0xd82   : > { %v1111_v7 = vadd.f32 %v2314_v30, %v1107_v31  ;;  %v1960_v8 = vpop.f32.mrb[1].mxu1 }
 0xd84   : > { %v1112_v33 = vsel %vm2320_vm9, %v1111_v7, 0.0  ;;  %v1135_v36 = vsel %vm204_vm8, %v1111_v7, 0.0  ;;  %v1123_v14 = vsel %vm203_vm7, %v1111_v7, 0.0 }
 0xd85   : > { %v1113_v35 = vsel %vm207_vm10, %v1112_v33, 0.0  ;;  %v1136_v37 = vsel %vm207_vm10, %v1135_v36, 0.0  ;;  %v1124_v48 = vsel %vm207_vm10, %v1123_v14, 0.0 }
 0xd86   : > { %1114 = vadd.xlane.f32.xlu1 %v1113_v35  ;;  %v1125_v49 = vrot.slane %v1124_v48, 4 }
 0xd88   : > { %v1126_v54 = vadd.f32 %v1125_v49, %v1124_v48 }
 0xd8a   : > { %1137 = vadd.xlane.f32.xlu1 %v1136_v37  ;;  %v1127_v56 = vrot.slane %v1126_v54, 2 }
 0xd8c   : > { %v1128_v62 = vadd.f32 %v1127_v56, %v1126_v54 }
 0xd8e   : > { %v1129_v1 = vrot.slane %v1128_v62, 1 }
 0xd90   : > { %v1130_v2 = vadd.f32 %v1129_v1, %v1128_v62 }
 0xe13   : > { %v1115_v38 = vpop.xlane.xlu1 %1114 }
 0xe14   : > { %v1116_v40 = vrot.slane %v1115_v38, 4 }
 0xe16   : > { %v1117_v41 = vadd.f32 %v1116_v40, %v1115_v38 }
 0xe17   : > { %v1138_v12 = vpop.xlane.xlu1 %1137 }
 0xe18   : > { %v1118_v42 = vrot.slane %v1117_v41, 2 }
 0xe1a   : > { %v1119_v43 = vadd.f32 %v1118_v42, %v1117_v41 }
 0xe1c   : > { %v1120_v44 = vrot.slane %v1119_v43, 1 }
 0xe1e   : > { %v1121_v46 = vadd.f32 %v1120_v44, %v1119_v43 }
 0xe20   : > { %2078 = vpush %v1121_v46 }
 0xe51   : > { %s2079_s30 = spop %2078 }
 0xe52   : > { %v1131_v58 = vstv %s2079_s30 }
 0xe53   : > { %2151 = vrcp.f32 %v1131_v58 }
 0xe5d   : > { %v2152_v4 = vpop.eup %2151 }
 0xe5e   : > { %v1133_v9 = vmul.f32 %v2152_v4, %v1130_v2  ;;  %v1134_v38 = vmul.f32 %v2152_v4, %v2356_v23 }
 0xe60   : > { %v1139_v15 = vmul.f32 %v1138_v12, %v1133_v9  ;;  %v1142_v40 = vmul.f32 %v1138_v12, %v1134_v38 }
 0xe62   : > { %v1140_v16 = vsub.f32 %v1111_v7, %v1139_v15  ;;  %v1143_v41 = vsub.f32 %v2314_v30, %v1142_v40 }
 0xe64   : > { %v1141_v17 = vsel %vm203_vm7, %v1133_v9, %v1140_v16  ;;  %v1144_v42 = vsel %vm203_vm7, %v1134_v38, %v1143_v41 }
 0xe65   : > { %v1145_v19 = vsel %vm2340_vm13, %v1141_v17, 0.0  ;;  %v1176_v5 = vsel %vm249_vm11, %v1141_v17, 0.0  ;;  %v1167_v43 = vsel %vm248_vm12, %v1144_v42, 0.0  ;;  %v1156_v44 = vsel %vm248_vm12, %v1141_v17, 0.0 }
 0xe66   : > { %v1146_v21 = vsel %vm207_vm10, %v1145_v19, 0.0  ;;  %v1177_v27 = vsel %vm207_vm10, %v1176_v5, 0.0  ;;  %v1168_v46 = vsel %vm207_vm10, %v1167_v43, 0.0  ;;  %v1157_v14 = vsel %vm207_vm10, %v1156_v44, 0.0 }
 0xe67   : > { %1147 = vadd.xlane.f32.xlu1 %v1146_v21  ;;  %v1169_v48 = vrot.slane %v1168_v46, 4  ;;  %v1158_v49 = vrot.slane %v1157_v14, 4 }
 0xe69   : > { %v1170_v54 = vadd.f32 %v1169_v48, %v1168_v46  ;;  %v1159_v56 = vadd.f32 %v1158_v49, %v1157_v14 }
 0xe6b   : > { %1178 = vadd.xlane.f32.xlu1 %v1177_v27  ;;  %v1160_v58 = vrot.slane %v1159_v56, 2  ;;  %v1171_v62 = vrot.slane %v1170_v54, 2 }
 0xe6d   : > { %v1172_v2 = vadd.f32 %v1171_v62, %v1170_v54  ;;  %v1161_v4 = vadd.f32 %v1160_v58, %v1159_v56 }
 0xe6f   : > { %v1173_v9 = vrot.slane %v1172_v2, 1  ;;  %v1162_v12 = vrot.slane %v1161_v4, 1 }
 0xe71   : > { %v1174_v15 = vadd.f32 %v1173_v9, %v1172_v2  ;;  %v1163_v16 = vadd.f32 %v1162_v12, %v1161_v4 }
 0xef4   : > { %v1148_v31 = vpop.xlane.xlu1 %1147 }
 0xef5   : > { %v1149_v8 = vrot.slane %v1148_v31, 4 }
 0xef7   : > { %v1150_v33 = vadd.f32 %v1149_v8, %v1148_v31 }
 0xef8   : > { %v1179_v27 = vpop.xlane.xlu1 %1178 }
 0xef9   : > { %v1151_v35 = vrot.slane %v1150_v33, 2 }
 0xefb   : > { %v1152_v7 = vadd.f32 %v1151_v35, %v1150_v33 }
 0xefd   : > { %v1153_v36 = vrot.slane %v1152_v7, 1 }
 0xeff   : > { %v1154_v37 = vadd.f32 %v1153_v36, %v1152_v7 }
 0xf01   : > { %2080 = vpush %v1154_v37 }
 0xf32   : > { %s2081_s6 = spop %2080 }
 0xf33   : > { %v1164_v1 = vstv %s2081_s6 }
 0xf34   : > { %2153 = vrcp.f32 %v1164_v1 }
 0xf3e   : > { %v2154_v19 = vpop.eup %2153 }
 0xf3f   : > { %v1175_v21 = vmul.f32 %v2154_v19, %v1174_v15  ;;  %v1166_v5 = vmul.f32 %v2154_v19, %v1163_v16 }
 0xf41   : > { %v1183_v31 = vmul.f32 %v1179_v27, %v1175_v21  ;;  %v1180_v8 = vmul.f32 %v1179_v27, %v1166_v5 }
 0xf43   : > { %v1181_v33 = vsub.f32 %v1141_v17, %v1180_v8  ;;  %v1184_v35 = vsub.f32 %v1144_v42, %v1183_v31 }
 0xf45   : > { %v1182_v7 = vsel %vm248_vm12, %v1166_v5, %v1181_v33  ;;  %v1185_v36 = vsel %vm248_vm12, %v1175_v21, %v1184_v35 }
 0xf46   : > { %v1186_v37 = vsel %vm2374_vm6, %v1182_v7, 0.0  ;;  %v1217_v40 = vsel %vm2848_vm2, %v1182_v7, 0.0  ;;  %v1197_v49 = vsel %vm2849_vm14, %v1182_v7, 0.0  ;;  %v1208_v54 = vsel %vm2850_vm0, %v1185_v36, 0.0  ;;  %vm2852_vm2 = vmmov %vm2850_vm0 }
 0xf47   : > { %v1187_v38 = vsel %vm207_vm10, %v1186_v37, 0.0  ;;  %v1218_v41 = vsel %vm207_vm10, %v1217_v40, 0.0  ;;  %v1198_v56 = vsel %vm207_vm10, %v1197_v49, 0.0  ;;  %v1209_v58 = vsel %vm207_vm10, %v1208_v54, 0.0 }
 0xf48   : > { %1188 = vadd.xlane.f32.xlu1 %v1187_v38  ;;  %v1199_v62 = vrot.slane %v1198_v56, 4  ;;  %v1210_v1 = vrot.slane %v1209_v58, 4  ;;  %vm2853_vm14 = vcmp.eq.s32.totalorder %v2307_v29, 3  ;;  %vm2854_vm0 = vcmp.eq.s32.totalorder %v2305_v28, 3 }
 0xf4a   : > { %v1200_v2 = vadd.f32 %v1199_v62, %v1198_v56  ;;  %v1211_v4 = vadd.f32 %v1210_v1, %v1209_v58 }
 0xf4c   : > { %1219 = vadd.xlane.f32.xlu1 %v1218_v41  ;;  %v1201_v9 = vrot.slane %v1200_v2, 2  ;;  %v1212_v12 = vrot.slane %v1211_v4, 2 }
 0xf4e   : > { %v1202_v16 = vadd.f32 %v1201_v9, %v1200_v2  ;;  %v1213_v19 = vadd.f32 %v1212_v12, %v1211_v4 }
 0xf50   : > { %v1203_v21 = vrot.slane %v1202_v16, 1  ;;  %v1214_v5 = vrot.slane %v1213_v19, 1 }
 0xf52   : > { %v1204_v27 = vadd.f32 %v1203_v21, %v1202_v16  ;;  %v1215_v31 = vadd.f32 %v1214_v5, %v1213_v19 }
 0xfd5   : > { %v1189_v17 = vpop.xlane.xlu1 %1188 }
 0xfd6   : > { %v1190_v42 = vrot.slane %v1189_v17, 4 }
 0xfd8   : > { %v1191_v43 = vadd.f32 %v1190_v42, %v1189_v17 }
 0xfd9   : > { %v1220_v37 = vpop.xlane.xlu1 %1219 }
 0xfda   : > { %v1192_v44 = vrot.slane %v1191_v43, 2 }
 0xfdc   : > { %v1193_v46 = vadd.f32 %v1192_v44, %v1191_v43 }
 0xfde   : > { %v1194_v14 = vrot.slane %v1193_v46, 1 }
 0xfe0   : > { %v1195_v48 = vadd.f32 %v1194_v14, %v1193_v46 }
 0xfe2   : > { %2082 = vpush %v1195_v48 }
0x1013   : > { %s2083_s7 = spop %2082 }
0x1014   : > { %v1205_v15 = vstv %s2083_s7 }
0x1015   : > { %2155 = vrcp.f32 %v1205_v15 }
0x101f   : > { %v2156_v8 = vpop.eup %2155 }
0x1020   : > { %v1207_v33 = vmul.f32 %v2156_v8, %v1204_v27  ;;  %v1216_v35 = vmul.f32 %v2156_v8, %v1215_v31 }
0x1022   : > { %v1221_v38 = vmul.f32 %v1220_v37, %v1207_v33  ;;  %v1224_v40 = vmul.f32 %v1220_v37, %v1216_v35 }
0x1024   : > { %v1222_v41 = vsub.f32 %v1182_v7, %v1221_v38  ;;  %v1225_v17 = vsub.f32 %v1185_v36, %v1224_v40 }
0x1026   : > { %v1223_v42 = vsel %vm2851_vm3, %v1207_v33, %v1222_v41  ;;  %v1226_v43 = vsel %vm2852_vm2, %v1216_v35, %v1225_v17  ;;  %vm2855_vm3 = vmmov %vm2854_vm0  ;;  %vm2856_vm2 = vmmov 0  }
0x1027   : > { %v1227_v44 = vsel %vm2400_vm15, %v1223_v42, 0.0  ;;  %v1249_v14 = vsel %vm2853_vm14, %v1223_v42, 0.0  ;;  %vm2857_vm14 = vcmask 1043456  }
0x1028   : > { %v1228_v46 = vsel %vm207_vm10, %v1227_v44, 0.0  ;;  %v1250_v48 = vsel %vm207_vm10, %v1249_v14, 0.0 }
0x1029   : > { %1229 = vadd.xlane.f32.xlu1 %v1228_v46 }
0x102d   : > { %1251 = vadd.xlane.f32.xlu1 %v1250_v48 }
0x1031   : > { %1583 = vadd.xlane.f32.xlu1 %v2665_v24  ;;  %v1238_v24 = vsel %vm2854_vm0, %v1226_v43, 0.0  ;;  %vm2858_vm0 = vmmov %vm2857_vm14 }
0x1032   : > { %v1239_v21 = vsel %vm207_vm10, %v1238_v24, 0.0 }
0x1033   : > { %v1240_v5 = vrot.slane %v1239_v21, 4 }
0x1035   : > { %v1241_v27 = vadd.f32 %v1240_v5, %v1239_v21 }
0x1037   : > { %v1242_v31 = vrot.slane %v1241_v27, 2 }
0x1039   : > { %v1243_v33 = vadd.f32 %v1242_v31, %v1241_v27 }
0x103b   : > { %v1244_v35 = vrot.slane %v1243_v33, 1 }
0x103d   : > { %v1245_v37 = vadd.f32 %v1244_v35, %v1243_v33 }
0x10b6   : > { %v1230_v7 = vpop.xlane.xlu1 %1229 }
0x10b7   : > { %v1231_v36 = vrot.slane %v1230_v7, 4 }
0x10b9   : > { %v1232_v49 = vadd.f32 %v1231_v36, %v1230_v7 }
0x10ba   : > { %v1252_v54 = vpop.xlane.xlu1 %1251 }
0x10bb   : > { %v1233_v56 = vrot.slane %v1232_v49, 2 }
0x10bd   : > { %v1234_v58 = vadd.f32 %v1233_v56, %v1232_v49 }
0x10be   : > { %v1584_v62 = vpop.xlane.xlu1 %1583 }
0x10bf   : > { %v1585_v1 = vrot.slane %v1584_v62, 4  ;;  %v1235_v2 = vrot.slane %v1234_v58, 1 }
0x10c1   : > { %v1586_v4 = vadd.f32 %v1585_v1, %v1584_v62  ;;  %v1236_v9 = vadd.f32 %v1235_v2, %v1234_v58 }
0x10c3   : > { %v1587_v12 = vrot.slane %v1586_v4, 2  ;;  %2084 = vpush %v1236_v9 }
0x10c5   : > { %v1588_v15 = vadd.f32 %v1587_v12, %v1586_v4 }
0x10c7   : > { %v1589_v16 = vrot.slane %v1588_v15, 1 }
0x10c9   : > { %v1590_v19 = vadd.f32 %v1589_v16, %v1588_v15 }
0x10cb   : > { %2086 = vpush %v1590_v19 }
0x10f4   : > { %s2085_s8 = spop %2084 }
0x10f5   : > { %v1246_v8 = vstv %s2085_s8 }
0x10f6   : > { %2157 = vrcp.f32 %v1246_v8 }
0x10fc   : > { %s2087_s9 = spop %2086 }
0x1100   : > { %v2158_v38 = vpop.eup %2157 }
0x1101   : > { %v1248_v40 = vmul.f32 %v2158_v38, %v1245_v37 }
0x1103   : > { %v1253_v41 = vmul.f32 %v1252_v54, %v1248_v40 }
0x1105   : > { %v1254_v17 = vsub.f32 %v1226_v43, %v1253_v41 }
0x1107   : > { %v1255_v42 = vsel %vm2855_vm3, %v1248_v40, %v1254_v17 }
0x1108   : > { %1970 = vmatmul.mubr.msk.f32.vlgmr.msra.gmra.mrb[4].mxu0 %vm368_vm1, %v1255_v42 }
0x1109   : > { %1999 = vmatprep.mubr.msk.f32.mxu0 %vm2856_vm2, %v2173_v11 }
0x11db   : > { %v1337_v44 = vpop.f32.mrb[4].mxu0 }
0x11dc   : > { %v1971_v46 = vpop.f32.mrb[5].mxu0  ;;  %1972 = vmatprep.subr.msk.mxu1 %vm44_vm5, %v1337_v44 }
0x11dd   : > { %1973 = vmatpush3.xpose.msk.msra.mxu1 %vm44_vm5, %v1337_v44 }
0x11de   : > { %2050 = vmatprep.subr.bf16.mxu1 %v2171_v10 }
0x11e0   : > { %1975 = vmatmul.mubr.msk.f32.vlgmr.msra.gmra.mrb[2].mxu1 %vm44_vm5, %v2434_v22 }
0x11e1   : > { %2052 = vmatpush3.bf16.msra.mxu1 %v2051_v59  ;;  %1977 = vmatprep.mubr.msk.f32.mxu1 %vm44_vm5, %v2442_v25 }
0x11e2   : > { %2053 = vmatprep.subr.bf16.mxu1 %v2171_v10 }
0x11e4   : > { %1978 = vmatmul.mubr.msk.f32.gmra.mrb[4].mxu1 %vm44_vm5, %v2451_v26 }
0x11e5   : > { %2055 = vmatpush3.bf16.msra.mxu1 %v2054_v3  ;;  %1988 = vmatprep.mubr.msk.f32.mxu1 %vm2856_vm2, %v2173_v11  ;;  %vm2859_vm2 = vcmask 2048  }
0x11e8   : > { %1989 = vmatmul.mubr.msk.f32.vlgmr.msra.gmra.mrb[6].mxu1 %vm44_vm5, %v1337_v44 }
0x11e9   : > { %2004 = vmatprep.mubr.msk.f32.mxu1 %vm368_vm1, %v2639_v39 }
0x12b3   : > { %v1976_v59 = vpop.f32.mrb[2].mxu1 }
0x12b4   : > { %v1595_v43 = vmul.f32 %v1976_v59, %v2635_v34  ;;  %1764 = vst.msk [vmem:[#allocation2 + $0x8] sm:$0xff] %vm368_vm1, %v1976_v59  ;;  %v1410_v14 = vpop.f32.mrb[3].mxu1 }
0x12b5   : > { %v2057_v48 = vpack.c.bf16 %v1976_v59, %v1410_v14  ;;  %v1594_v7 = vmul.f32 %v1410_v14, %v2639_v39  ;;  %1763 = vst.msk [vmem:[#allocation2] sm:$0xff] %vm368_vm1, %v1410_v14 }
0x12b6   : > { %v1599_v3 = vsel %vm368_vm1, %v1595_v43, 0.0 }
0x12b7   : > { %v1598_v11 = vsel %vm368_vm1, %v1594_v7, 0.0  ;;  %v1979_v36 = vpop.f32.mrb[4].mxu1  ;;  %2058 = vmatpush3.bf16.msra.mxu0 %v2057_v48 }
0x12b8   : > { %v1600_v49 = vadd.f32 %v1599_v3, %v1598_v11  ;;  %1766 = vst.msk [vmem:[#allocation2 + $0x18] sm:$0xff] %vm368_vm1, %v1979_v36  ;;  %v1420_v54 = vpop.f32.mrb[5].mxu1  ;;  %2059 = vmatprep.subr.bf16.mxu0 %v2171_v10  ;;  %v1597_v39 = vmul.f32 %v1979_v36, %v2647_v47 }
0x12b9   : > { %v2060_v56 = vpack.c.bf16 %v1979_v36, %v1420_v54  ;;  %v1596_v58 = vmul.f32 %v1420_v54, %v2655_v61  ;;  %1765 = vst.msk [vmem:[#allocation2 + $0x10] sm:$0xff] %vm368_vm1, %v1420_v54 }
0x12ba   : > { %v1603_v9 = vsel %vm368_vm1, %v1597_v39, 0.0 }
0x12bb   : > { %v1601_v62 = vsel %vm368_vm1, %v1596_v58, 0.0  ;;  %v1495_v1 = vpop.f32.mrb[6].mxu1  ;;  %2061 = vmatpush3.bf16.msra.mxu0 %v2060_v56 }
0x12bc   : > { %v1990_v2 = vpop.f32.mrb[7].mxu1  ;;  %v1602_v4 = vadd.f32 %v1601_v62, %v1600_v49  ;;  %v1569_v27 = vsub.f32 %v2314_v30, %v1495_v1 }
0x12be   : > { %2000 = vmatmul.mubr.msk.f32.vlgmr.msra.gmra.mrb[6].mxu0 %vm44_vm5, %v1337_v44  ;;  %v1604_v12 = vadd.f32 %v1603_v9, %v1602_v4  ;;  %v1570_v31 = vmul.f32 300.0, %v1569_v27 }
0x12c0   : > { %1605 = vadd.xlane.f32.xlu1 %v1604_v12 }
0x134d   : > { %v1606_v10 = vpop.xlane.xlu1 %1605 }
0x134e   : > { %v1607_v15 = vrot.slane %v1606_v10, 4 }
0x1350   : > { %v1608_v16 = vadd.f32 %v1607_v15, %v1606_v10 }
0x1352   : > { %v1609_v19 = vrot.slane %v1608_v16, 2 }
0x1354   : > { %v1610_v24 = vadd.f32 %v1609_v19, %v1608_v16  ;;  %v1768_v19 = vstv %s2165_s0  ;;  %s718_s0 = sadd.s32 1, %s2165_s0  }
0x1355   : > { %vm1769_vm3 = vcmp.eq.s32.totalorder %v2305_v28, %v1768_v19  ;;  %p715_p0 = scmp.ge.s32.totalorder %s718_s0, 3  }
0x1356   : > { %v1611_v21 = vrot.slane %v1610_v24, 1 }
0x1358   : > { %v1612_v5 = vadd.f32 %v1611_v21, %v1610_v24  ;;  %v1770_v21 = vld [vmem:[%s2809_s5] sm:$0x7] }
0x135a   : > { %2088 = vpush %v1612_v5 }
0x138b   : > { %s2089_s10 = spop %2088 }
0x138c   : > { %v1614_v1 = vstv %s2089_s10 }
0x1391   : > { %v1565_v8 = vpop.f32.mrb[6].mxu0 }
0x1392   : > { %v1571_v33 = vadd.f32 %v1570_v31, %v1565_v8  ;;  %v2001_v35 = vpop.f32.mrb[7].mxu0 }
0x1394   : > { %1767 = vst.msk [vmem:[#allocation3] sm:$0xf] %vm207_vm10, %v1571_v33  ;;  %2002 = vmatprep.subr.msk.mxu1 %vm2857_vm14, %v1571_v33 }
0x1395   : > { %2003 = vmatpush3.msk.msra.mxu1 %vm2858_vm0, %v1571_v33 }
0x1396   : > { %2005 = vmatmul.mubr.msk.f32.vlgmr.msra.gmra.mrb[8].mxu1 %vm368_vm1, %v2635_v34 }
0x1397   : > { %2007 = vmatprep.mubr.msk.f32.mxu1 %vm368_vm1, %v2655_v61 }
0x139a   : > { %2008 = vmatmul.mubr.msk.f32.gmra.mrb[10].mxu1 %vm368_vm1, %v2647_v47 }
0x1469   : > { %v2006_v37 = vpop.f32.mrb[8].mxu1 }
0x146a   : > { %v1704_v38 = vmul.f32 %v2006_v37, %v2564_v55  ;;  %v1684_v40 = vpop.f32.mrb[9].mxu1 }
0x146b   : > { %v1703_v41 = vmul.f32 %v1684_v40, %v2571_v13 }
0x146c   : > { %v1708_v17 = vsel %vm368_vm1, %v1704_v38, 0.0 }
0x146d   : > { %v1707_v42 = vsel %vm368_vm1, %v1703_v41, 0.0  ;;  %v2009_v44 = vpop.f32.mrb[10].mxu1 }
0x146e   : > { %v1709_v46 = vadd.f32 %v1708_v17, %v1707_v42  ;;  %v1706_v34 = vmul.f32 %v2009_v44, %v2583_v63  ;;  %v1694_v59 = vpop.f32.mrb[11].mxu1 }
0x146f   : > { %v1705_v61 = vmul.f32 %v1694_v59, %v2591_v0 }
0x1470   : > { %v1712_v14 = vsel %vm368_vm1, %v1706_v34, 0.0 }
0x1471   : > { %v1710_v43 = vsel %vm368_vm1, %v1705_v61, 0.0 }
0x1472   : > { %v1711_v47 = vadd.f32 %v1710_v43, %v1709_v46 }
0x1474   : > { %v1713_v55 = vadd.f32 %v1712_v14, %v1711_v47 }
0x1476   : > { %1714 = vadd.xlane.f32.xlu1 %v1713_v55 }
0x147a   : > { %1740 = vadd.xlane.f32.xlu1 %v2668_v6  ;;  %v1592_v6 = vstv %s2087_s9 }
0x147b   : > { %v1593_v4 = vmul.f32 0.5, %v1592_v6 }
0x147d   : > { %v1751_v12 = vsub.f32 %v1593_v4, %v1614_v1 }
0x1503   : > { %v1715_v13 = vpop.xlane.xlu1 %1714 }
0x1504   : > { %v1716_v48 = vrot.slane %v1715_v13, 4 }
0x1506   : > { %v1717_v7 = vadd.f32 %v1716_v48, %v1715_v13 }
0x1507   : > { %v1741_v3 = vpop.xlane.xlu1 %1740 }
0x1508   : > { %v1718_v11 = vrot.slane %v1717_v7, 2  ;;  %v1742_v36 = vrot.slane %v1741_v3, 4 }
0x150a   : > { %v1743_v49 = vadd.f32 %v1742_v36, %v1741_v3  ;;  %v1719_v63 = vadd.f32 %v1718_v11, %v1717_v7 }
0x150c   : > { %v1744_v54 = vrot.slane %v1743_v49, 2  ;;  %v1720_v56 = vrot.slane %v1719_v63, 1 }
0x150e   : > { %v1745_v0 = vadd.f32 %v1744_v54, %v1743_v49  ;;  %v1721_v58 = vadd.f32 %v1720_v56, %v1719_v63 }
0x1510   : > { %2090 = vpush %v1721_v58  ;;  %v1746_v39 = vrot.slane %v1745_v0, 1 }
0x1512   : > { %v1747_v62 = vadd.f32 %v1746_v39, %v1745_v0 }
0x1514   : > { %2092 = vpush %v1747_v62 }
0x1541   : > { %s2091_s11 = spop %2090 }
0x1542   : > { %v1723_v2 = vstv %s2091_s11 }
0x1543   : > { %v1724_v9 = vmul.f32 0.5, %v1723_v2 }
0x1545   : > { %s2093_s12 = spop %2092  ;;  %v1752_v15 = vadd.f32 %v1751_v12, %v1724_v9 }
0x1546   : > { %v1749_v10 = vstv %s2093_s12 }
0x1547   : > { %v1750_v16 = vmul.f32 -150.0, %v1749_v10 }
0x1548   :  { %717 = sbr.rel (!%p715_p0) target bundleno = 1943 (0x797), region = 55 }
0x1549   : > { %v1753_v24 = vsub.f32 %v1750_v16, %v1752_v15 }
0x154b   : > { %v1754_v5 = vsub.f32 0.0, %v1753_v24 }
0x154d   : > { %v1771_v27 = vsel %vm1769_vm3, %v1754_v5, %v1770_v21 }
0x154e   : > { %1772 = vst.msk [vmem:[%s2809_s5] sm:$0x7] %vm2859_vm2, %v1771_v27 }

</bundles_post_ra>
